<compile_context>
chip_gen: v5e
topology: v5e:2x2
jax: 0.10.0
libtpu: 0.0.40
codegen_flags: <defaults>
</compile_context>

<pallas_src>
import functools
import math

import jax
import jax.numpy as jnp
from jax import lax
from jax.experimental import pallas as pl
from jax.experimental.pallas import tpu as pltpu


# ----------------------------- config --------------------------------------
class TextConfig:
    hidden_size = 32
    num_attention_heads = 4
    d_c = 16          # compressed KV latent dim
    d_c_q = 16        # compressed Q latent dim
    d_rh = 8          # per-head rope dim
    intermediate_size = 64
    rms_norm_eps = 1e-6
    moe_layers = ()   # this layer_idx not in moe_layers -> dense MLP
    lora_rank = 4
    lora_alpha = 8


# --------------------------- fused kernel -----------------------------------
def _rms(x, w, eps):
    # x: (S, D) f32, w: (1, D) f32
    var = jnp.mean(x * x, axis=-1, keepdims=True)
    return x * lax.rsqrt(var + eps) * w


def _mm(a, w_ref):
    # MXU matmul: bf16 inputs, f32 accumulation.
    w = w_ref[...]
    return jnp.dot(a.astype(w.dtype), w, preferred_element_type=jnp.float32)


def _rotate_half(x):
    half = x.shape[-1] // 2
    x1 = x[:, :half]
    x2 = x[:, half:]
    return jnp.concatenate([-x2, x1], axis=-1)


def _decoder_layer_kernel(
    # inputs (per-batch blocks)
    x_ref, cos_ref, sin_ref,
    # resident weights (constant index maps)
    n1_ref, qd_ref, qn_ref, qu_ref, kvd_ref, kvn_ref, kvu_ref, op_ref,
    n2_ref, wg_ref, wu_ref, wd_ref,
    # output
    o_ref,
    *, nH, hd, d_rh, d_c, eps):
    x = x_ref[0].astype(jnp.float32)          # (S, H)
    cos = cos_ref[0].astype(jnp.float32)      # (S, d_rh)
    sin = sin_ref[0].astype(jnp.float32)      # (S, d_rh)
    S = x.shape[0]

    # ---- norm1 ----
    residual = x
    h = _rms(x, n1_ref[...], eps)             # (S, H)

    # ---- MLA projections (all heads at once, lane-dense) ----
    cq = _rms(_mm(h, qd_ref), qn_ref[...], eps)          # (S, d_c_q)
    q = _mm(cq, qu_ref)                                   # (S, nH*(hd+d_rh))
    ckv_full = _mm(h, kvd_ref)                            # (S, d_c + d_rh)
    ckv = _rms(ckv_full[:, :d_c], kvn_ref[...], eps)      # (S, d_c)
    k_rope = ckv_full[:, d_c:]                            # (S, d_rh) shared key
    kv = _mm(ckv, kvu_ref)                                # (S, nH*2*hd)

    # ---- RoPE on the shared rope key (in-kernel) ----
    k_rope = k_rope * cos + _rotate_half(k_rope) * sin

    # ---- causal mask generated in-kernel (no mask input / HBM traffic) ----
    row = lax.broadcasted_iota(jnp.int32, (S, S), 0)
    col = lax.broadcasted_iota(jnp.int32, (S, S), 1)
    causal = row >= col

    dq = hd + d_rh
    scale = 1.0 / math.sqrt(dq)

    # ---- attention: all heads in this one kernel, unrolled at trace time ----
    head_outs = []
    for hh in range(nH):
        q_h = q[:, hh * dq:(hh + 1) * dq]                 # (S, hd+d_rh)
        q_nope = q_h[:, :hd]
        q_rope = q_h[:, hd:]
        q_rope = q_rope * cos + _rotate_half(q_rope) * sin
        k_nope = kv[:, hh * 2 * hd: hh * 2 * hd + hd]     # (S, hd)
        v_h = kv[:, hh * 2 * hd + hd: (hh + 1) * 2 * hd]  # (S, hd)

        qf = jnp.concatenate([q_nope, q_rope], axis=-1).astype(jnp.bfloat16)
        kf = jnp.concatenate([k_nope, k_rope], axis=-1).astype(jnp.bfloat16)

        s = jnp.dot(qf, kf.T, preferred_element_type=jnp.float32) * scale
        s = jnp.where(causal, s, jnp.float32(-1e30))
        m = jnp.max(s, axis=-1, keepdims=True)
        p = jnp.exp(s - m)
        denom = jnp.sum(p, axis=-1, keepdims=True)
        p = p * pl.reciprocal(denom, approx=True)         # EUP vrcp slot
        o_h = jnp.dot(p.astype(jnp.bfloat16), v_h.astype(jnp.bfloat16),
                      preferred_element_type=jnp.float32)  # (S, hd)
        head_outs.append(o_h)

    attn = jnp.concatenate(head_outs, axis=-1)            # (S, nH*hd)

    # ---- o_proj + residual (fused epilogue) ----
    h = residual + _mm(attn, op_ref)                      # (S, H)

    # ---- norm2 + SwiGLU MLP + residual (fused epilogue) ----
    h2 = _rms(h, n2_ref[...], eps)
    g = _mm(h2, wg_ref)                                   # (S, I)
    u = _mm(h2, wu_ref)                                   # (S, I)
    act = (g * jax.nn.sigmoid(g)) * u                     # SiLU(gate) * up, f32
    out = h + _mm(act, wd_ref)                            # (S, H)

    o_ref[0] = out.astype(o_ref.dtype)


# --------------------------- parameters -------------------------------------
def init_params(key, cfg):
    H = cfg.hidden_size
    nH = cfg.num_attention_heads
    hd = H // nH
    d_rh = cfg.d_rh
    I = cfg.intermediate_size
    ks = jax.random.split(key, 8)
    std = 0.02

    def w(k, shape):
        # bf16 MXU weights (f32 accumulation inside the kernel).
        return (std * jax.random.normal(k, shape)).astype(jnp.bfloat16)

    return {
        "norm1_w": jnp.ones((1, H), jnp.float32),
        "norm2_w": jnp.ones((1, H), jnp.float32),
        # MLA
        "q_down": w(ks[0], (H, cfg.d_c_q)),
        "q_norm_w": jnp.ones((1, cfg.d_c_q), jnp.float32),
        "q_up": w(ks[1], (cfg.d_c_q, nH * (hd + d_rh))),
        "kv_down": w(ks[2], (H, cfg.d_c + d_rh)),
        "kv_norm_w": jnp.ones((1, cfg.d_c), jnp.float32),
        "kv_up": w(ks[3], (cfg.d_c, nH * (hd + hd))),
        "o_proj": w(ks[4], (nH * hd, H)),
        # MLP (SwiGLU)
        "gate": w(ks[5], (H, I)),
        "up": w(ks[6], (H, I)),
        "down": w(ks[7], (I, H)),
    }


_WEIGHT_ORDER = ("norm1_w", "q_down", "q_norm_w", "q_up", "kv_down",
                 "kv_norm_w", "kv_up", "o_proj", "norm2_w", "gate", "up",
                 "down")


# --------------------------- forward (single pallas_call) --------------------
def decoder_layer_forward(params, hidden_states, position_embeddings,
                          attention_mask=None, cfg=TextConfig):
    # TODO(synk): external attention_mask is not plumbed into the fused kernel;
    # the causal mask is generated in-kernel (the reference default path).
    B, S, H = hidden_states.shape
    nH = cfg.num_attention_heads
    hd = H // nH
    cos, sin = position_embeddings            # each (B, S, d_rh)

    kernel = functools.partial(
        _decoder_layer_kernel, nH=nH, hd=hd, d_rh=cfg.d_rh, d_c=cfg.d_c,
        eps=cfg.rms_norm_eps)

    def w_spec(arr):
        nd = arr.ndim
        # constant index map -> weight DMA'd once, stays resident in VMEM
        return pl.BlockSpec(arr.shape, lambda b, _nd=nd: (0,) * _nd)

    in_specs = [
        pl.BlockSpec((1, S, H), lambda b: (b, 0, 0)),          # hidden_states
        pl.BlockSpec((1, S, cfg.d_rh), lambda b: (b, 0, 0)),   # cos
        pl.BlockSpec((1, S, cfg.d_rh), lambda b: (b, 0, 0)),   # sin
    ] + [w_spec(params[k]) for k in _WEIGHT_ORDER]

    out = pl.pallas_call(
        kernel,
        grid=(B,),
        in_specs=in_specs,
        out_specs=pl.BlockSpec((1, S, H), lambda b: (b, 0, 0)),
        out_shape=jax.ShapeDtypeStruct((B, S, H), jnp.float32),
        compiler_params=pltpu.CompilerParams(
            dimension_semantics=("parallel",)),     # v7x: shard batch over 2 TCs
    )(hidden_states.astype(jnp.float32),
      cos.astype(jnp.float32),
      sin.astype(jnp.float32),
      *[params[k] for k in _WEIGHT_ORDER])

    # matches reference return: (hidden_states, attn_weights, router_logits, past_key_value)
    return out, None, None, None


# ------------------------------- main ----------------------------------------
def make_position_embeddings(B, S, d_rh):
    half = d_rh // 2
    inv_freq = 1.0 / (10000.0 ** (jnp.arange(half, dtype=jnp.float32) / half))
    angles = jnp.arange(S, dtype=jnp.float32)[:, None] * inv_freq[None, :]
    emb = jnp.concatenate([angles, angles], axis=-1)          # (S, d_rh)
    cos = jnp.broadcast_to(jnp.cos(emb)[None], (B, S, d_rh))
    sin = jnp.broadcast_to(jnp.sin(emb)[None], (B, S, d_rh))
    return cos, sin


if __name__ == "__main__":
    cfg = TextConfig
    B, S, H = 2, 8, cfg.hidden_size

    key = jax.random.PRNGKey(0)
    k_param, k_x = jax.random.split(key)
    params = init_params(k_param, cfg)
    hidden_states = jax.random.normal(k_x, (B, S, H), jnp.float32)
    pos_emb = make_position_embeddings(B, S, cfg.d_rh)

    out, attn_w, router_logits, past_kv = decoder_layer_forward(
        params, hidden_states, pos_emb, attention_mask=None, cfg=cfg)
    out = jax.block_until_ready(out)

    assert out.shape == (B, S, H)
    assert bool(jnp.all(jnp.isfinite(out)))
    print("KERNEL_OK")
</pallas_src>

<mosaic_0001>
module attributes {stable_mosaic.version = 11 : i64} {
  func.func @_decoder_layer_kernel(%arg0: i32, %arg1: memref<1x8x32xf32, #tpu.memory_space<vmem>>, %arg2: memref<1x8x8xf32, #tpu.memory_space<vmem>>, %arg3: memref<1x8x8xf32, #tpu.memory_space<vmem>>, %arg4: memref<1x32xf32, #tpu.memory_space<vmem>>, %arg5: memref<32x16xbf16, #tpu.memory_space<vmem>>, %arg6: memref<1x16xf32, #tpu.memory_space<vmem>>, %arg7: memref<16x64xbf16, #tpu.memory_space<vmem>>, %arg8: memref<32x24xbf16, #tpu.memory_space<vmem>>, %arg9: memref<1x16xf32, #tpu.memory_space<vmem>>, %arg10: memref<16x64xbf16, #tpu.memory_space<vmem>>, %arg11: memref<32x32xbf16, #tpu.memory_space<vmem>>, %arg12: memref<1x32xf32, #tpu.memory_space<vmem>>, %arg13: memref<32x64xbf16, #tpu.memory_space<vmem>>, %arg14: memref<32x64xbf16, #tpu.memory_space<vmem>>, %arg15: memref<64x32xbf16, #tpu.memory_space<vmem>>, %arg16: memref<1x8x32xf32, #tpu.memory_space<vmem>>) attributes {dimension_semantics = [#tpu.dimension_semantics<parallel>], iteration_bounds = array<i64: 2>, scalar_prefetch = 0 : i64, scratch_operands = 0 : i64, tpu.core_type = #tpu.core_type<tc>, window_params = [{transform_indices = @transform_0, window_bounds = array<i64: 1, 8, 32>}, {transform_indices = @transform_1, window_bounds = array<i64: 1, 8, 8>}, {transform_indices = @transform_2, window_bounds = array<i64: 1, 8, 8>}, {pipeline_mode = #tpu.pipeline_mode<synchronous>, transform_indices = @transform_3, window_bounds = array<i64: 1, 32>}, {pipeline_mode = #tpu.pipeline_mode<synchronous>, transform_indices = @transform_4, window_bounds = array<i64: 32, 16>}, {pipeline_mode = #tpu.pipeline_mode<synchronous>, transform_indices = @transform_5, window_bounds = array<i64: 1, 16>}, {pipeline_mode = #tpu.pipeline_mode<synchronous>, transform_indices = @transform_6, window_bounds = array<i64: 16, 64>}, {pipeline_mode = #tpu.pipeline_mode<synchronous>, transform_indices = @transform_7, window_bounds = array<i64: 32, 24>}, {pipeline_mode = #tpu.pipeline_mode<synchronous>, transform_indices = @transform_8, window_bounds = array<i64: 1, 16>}, {pipeline_mode = #tpu.pipeline_mode<synchronous>, transform_indices = @transform_9, window_bounds = array<i64: 16, 64>}, {pipeline_mode = #tpu.pipeline_mode<synchronous>, transform_indices = @transform_10, window_bounds = array<i64: 32, 32>}, {pipeline_mode = #tpu.pipeline_mode<synchronous>, transform_indices = @transform_11, window_bounds = array<i64: 1, 32>}, {pipeline_mode = #tpu.pipeline_mode<synchronous>, transform_indices = @transform_12, window_bounds = array<i64: 32, 64>}, {pipeline_mode = #tpu.pipeline_mode<synchronous>, transform_indices = @transform_13, window_bounds = array<i64: 32, 64>}, {pipeline_mode = #tpu.pipeline_mode<synchronous>, transform_indices = @transform_14, window_bounds = array<i64: 64, 32>}, {transform_indices = @transform_15, window_bounds = array<i64: 1, 8, 32>}]} {
    %c0 = arith.constant 0 : index
    %c0_0 = arith.constant 0 : index
    %c0_1 = arith.constant 0 : index
    %0 = vector.load %arg1[%c0, %c0_0, %c0_1] : memref<1x8x32xf32, #tpu.memory_space<vmem>>, vector<1x8x32xf32>
    %1 = vector.shape_cast %0 : vector<1x8x32xf32> to vector<8x32xf32>
    %c0_2 = arith.constant 0 : index
    %c0_3 = arith.constant 0 : index
    %c0_4 = arith.constant 0 : index
    %2 = vector.load %arg2[%c0_2, %c0_3, %c0_4] : memref<1x8x8xf32, #tpu.memory_space<vmem>>, vector<1x8x8xf32>
    %3 = vector.shape_cast %2 : vector<1x8x8xf32> to vector<8x8xf32>
    %c0_5 = arith.constant 0 : index
    %c0_6 = arith.constant 0 : index
    %c0_7 = arith.constant 0 : index
    %4 = vector.load %arg3[%c0_5, %c0_6, %c0_7] : memref<1x8x8xf32, #tpu.memory_space<vmem>>, vector<1x8x8xf32>
    %5 = vector.shape_cast %4 : vector<1x8x8xf32> to vector<8x8xf32>
    %c0_8 = arith.constant 0 : index
    %c0_9 = arith.constant 0 : index
    %6 = vector.load %arg4[%c0_8, %c0_9] : memref<1x32xf32, #tpu.memory_space<vmem>>, vector<1x32xf32>
    %7 = arith.mulf %1, %1 : vector<8x32xf32>
    %cst = arith.constant dense<0.000000e+00> : vector<8xf32>
    %8 = vector.multi_reduction <add>, %7, %cst [1] : vector<8x32xf32> to vector<8xf32>
    %9 = vector.shape_cast %8 : vector<8xf32> to vector<8x1xf32>
    %cst_10 = arith.constant 3.200000e+01 : f32
    %10 = vector.broadcast %cst_10 : f32 to vector<8x1xf32>
    %11 = arith.divf %9, %10 : vector<8x1xf32>
    %cst_11 = arith.constant 9.99999997E-7 : f32
    %12 = vector.broadcast %cst_11 : f32 to vector<8x1xf32>
    %13 = arith.addf %11, %12 : vector<8x1xf32>
    %14 = math.rsqrt %13 : vector<8x1xf32>
    %15 = vector.broadcast %14 : vector<8x1xf32> to vector<8x32xf32>
    %16 = arith.mulf %1, %15 : vector<8x32xf32>
    %17 = vector.broadcast %6 : vector<1x32xf32> to vector<8x32xf32>
    %18 = arith.mulf %16, %17 : vector<8x32xf32>
    %c0_12 = arith.constant 0 : index
    %c0_13 = arith.constant 0 : index
    %19 = vector.load %arg5[%c0_12, %c0_13] : memref<32x16xbf16, #tpu.memory_space<vmem>>, vector<32x16xbf16>
    %20 = arith.truncf %18 : vector<8x32xf32> to vector<8x32xbf16>
    %cst_14 = arith.constant dense<0.000000e+00> : vector<8x16xf32>
    %21 = tpu.matmul %20, %19, %cst_14 {dimension_numbers = #tpu.dot_dimension_numbers<[1], [0], [0], [1], [0, 0, 1, 1], [], []>} : vector<8x32xbf16>, vector<32x16xbf16>, vector<8x16xf32> -> vector<8x16xf32>
    %c0_15 = arith.constant 0 : index
    %c0_16 = arith.constant 0 : index
    %22 = vector.load %arg6[%c0_15, %c0_16] : memref<1x16xf32, #tpu.memory_space<vmem>>, vector<1x16xf32>
    %23 = arith.mulf %21, %21 : vector<8x16xf32>
    %cst_17 = arith.constant dense<0.000000e+00> : vector<8xf32>
    %24 = vector.multi_reduction <add>, %23, %cst_17 [1] : vector<8x16xf32> to vector<8xf32>
    %25 = vector.shape_cast %24 : vector<8xf32> to vector<8x1xf32>
    %cst_18 = arith.constant 1.600000e+01 : f32
    %26 = vector.broadcast %cst_18 : f32 to vector<8x1xf32>
    %27 = arith.divf %25, %26 : vector<8x1xf32>
    %cst_19 = arith.constant 9.99999997E-7 : f32
    %28 = vector.broadcast %cst_19 : f32 to vector<8x1xf32>
    %29 = arith.addf %27, %28 : vector<8x1xf32>
    %30 = math.rsqrt %29 : vector<8x1xf32>
    %31 = vector.broadcast %30 : vector<8x1xf32> to vector<8x16xf32>
    %32 = arith.mulf %21, %31 : vector<8x16xf32>
    %33 = vector.broadcast %22 : vector<1x16xf32> to vector<8x16xf32>
    %34 = arith.mulf %32, %33 : vector<8x16xf32>
    %c0_20 = arith.constant 0 : index
    %c0_21 = arith.constant 0 : index
    %35 = vector.load %arg7[%c0_20, %c0_21] : memref<16x64xbf16, #tpu.memory_space<vmem>>, vector<16x64xbf16>
    %36 = arith.truncf %34 : vector<8x16xf32> to vector<8x16xbf16>
    %cst_22 = arith.constant dense<0.000000e+00> : vector<8x64xf32>
    %37 = tpu.matmul %36, %35, %cst_22 {dimension_numbers = #tpu.dot_dimension_numbers<[1], [0], [0], [1], [0, 0, 1, 1], [], []>} : vector<8x16xbf16>, vector<16x64xbf16>, vector<8x64xf32> -> vector<8x64xf32>
    %c0_23 = arith.constant 0 : index
    %c0_24 = arith.constant 0 : index
    %38 = vector.load %arg8[%c0_23, %c0_24] : memref<32x24xbf16, #tpu.memory_space<vmem>>, vector<32x24xbf16>
    %39 = arith.truncf %18 : vector<8x32xf32> to vector<8x32xbf16>
    %cst_25 = arith.constant dense<0.000000e+00> : vector<8x24xf32>
    %40 = tpu.matmul %39, %38, %cst_25 {dimension_numbers = #tpu.dot_dimension_numbers<[1], [0], [0], [1], [0, 0, 1, 1], [], []>} : vector<8x32xbf16>, vector<32x24xbf16>, vector<8x24xf32> -> vector<8x24xf32>
    %41 = vector.extract_strided_slice %40 {offsets = [0, 0], sizes = [8, 16], strides = [1, 1]} : vector<8x24xf32> to vector<8x16xf32>
    %c0_26 = arith.constant 0 : index
    %c0_27 = arith.constant 0 : index
    %42 = vector.load %arg9[%c0_26, %c0_27] : memref<1x16xf32, #tpu.memory_space<vmem>>, vector<1x16xf32>
    %43 = arith.mulf %41, %41 : vector<8x16xf32>
    %cst_28 = arith.constant dense<0.000000e+00> : vector<8xf32>
    %44 = vector.multi_reduction <add>, %43, %cst_28 [1] : vector<8x16xf32> to vector<8xf32>
    %45 = vector.shape_cast %44 : vector<8xf32> to vector<8x1xf32>
    %cst_29 = arith.constant 1.600000e+01 : f32
    %46 = vector.broadcast %cst_29 : f32 to vector<8x1xf32>
    %47 = arith.divf %45, %46 : vector<8x1xf32>
    %cst_30 = arith.constant 9.99999997E-7 : f32
    %48 = vector.broadcast %cst_30 : f32 to vector<8x1xf32>
    %49 = arith.addf %47, %48 : vector<8x1xf32>
    %50 = math.rsqrt %49 : vector<8x1xf32>
    %51 = vector.broadcast %50 : vector<8x1xf32> to vector<8x16xf32>
    %52 = arith.mulf %41, %51 : vector<8x16xf32>
    %53 = vector.broadcast %42 : vector<1x16xf32> to vector<8x16xf32>
    %54 = arith.mulf %52, %53 : vector<8x16xf32>
    %55 = vector.extract_strided_slice %40 {offsets = [0, 16], sizes = [8, 8], strides = [1, 1]} : vector<8x24xf32> to vector<8x8xf32>
    %c0_31 = arith.constant 0 : index
    %c0_32 = arith.constant 0 : index
    %56 = vector.load %arg10[%c0_31, %c0_32] : memref<16x64xbf16, #tpu.memory_space<vmem>>, vector<16x64xbf16>
    %57 = arith.truncf %54 : vector<8x16xf32> to vector<8x16xbf16>
    %cst_33 = arith.constant dense<0.000000e+00> : vector<8x64xf32>
    %58 = tpu.matmul %57, %56, %cst_33 {dimension_numbers = #tpu.dot_dimension_numbers<[1], [0], [0], [1], [0, 0, 1, 1], [], []>} : vector<8x16xbf16>, vector<16x64xbf16>, vector<8x64xf32> -> vector<8x64xf32>
    %59 = arith.mulf %55, %3 : vector<8x8xf32>
    %60 = vector.extract_strided_slice %55 {offsets = [0, 0], sizes = [8, 4], strides = [1, 1]} : vector<8x8xf32> to vector<8x4xf32>
    %61 = vector.extract_strided_slice %55 {offsets = [0, 4], sizes = [8, 4], strides = [1, 1]} : vector<8x8xf32> to vector<8x4xf32>
    %cst_34 = arith.constant 0.000000e+00 : f32
    %62 = vector.broadcast %cst_34 : f32 to vector<8x4xf32>
    %63 = arith.subf %62, %61 : vector<8x4xf32>
    %64 = tpu.concatenate %63, %60 in 1 : vector<8x4xf32>, vector<8x4xf32> -> vector<8x8xf32>
    %65 = arith.mulf %64, %5 : vector<8x8xf32>
    %66 = arith.addf %59, %65 : vector<8x8xf32>
    %67 = tpu.iota {dimensions = array<i32: 0>} : vector<8x8xi32>
    %68 = tpu.iota {dimensions = array<i32: 1>} : vector<8x8xi32>
    %69 = arith.cmpi sge, %67, %68 : vector<8x8xi32>
    %70 = vector.extract_strided_slice %37 {offsets = [0, 0], sizes = [8, 16], strides = [1, 1]} : vector<8x64xf32> to vector<8x16xf32>
    %71 = vector.extract_strided_slice %70 {offsets = [0, 0], sizes = [8, 8], strides = [1, 1]} : vector<8x16xf32> to vector<8x8xf32>
    %72 = vector.extract_strided_slice %70 {offsets = [0, 8], sizes = [8, 8], strides = [1, 1]} : vector<8x16xf32> to vector<8x8xf32>
    %73 = arith.mulf %72, %3 : vector<8x8xf32>
    %74 = vector.extract_strided_slice %72 {offsets = [0, 0], sizes = [8, 4], strides = [1, 1]} : vector<8x8xf32> to vector<8x4xf32>
    %75 = vector.extract_strided_slice %72 {offsets = [0, 4], sizes = [8, 4], strides = [1, 1]} : vector<8x8xf32> to vector<8x4xf32>
    %cst_35 = arith.constant 0.000000e+00 : f32
    %76 = vector.broadcast %cst_35 : f32 to vector<8x4xf32>
    %77 = arith.subf %76, %75 : vector<8x4xf32>
    %78 = tpu.concatenate %77, %74 in 1 : vector<8x4xf32>, vector<8x4xf32> -> vector<8x8xf32>
    %79 = arith.mulf %78, %5 : vector<8x8xf32>
    %80 = arith.addf %73, %79 : vector<8x8xf32>
    %81 = vector.extract_strided_slice %58 {offsets = [0, 0], sizes = [8, 8], strides = [1, 1]} : vector<8x64xf32> to vector<8x8xf32>
    %82 = vector.extract_strided_slice %58 {offsets = [0, 8], sizes = [8, 8], strides = [1, 1]} : vector<8x64xf32> to vector<8x8xf32>
    %83 = tpu.concatenate %71, %80 in 1 : vector<8x8xf32>, vector<8x8xf32> -> vector<8x16xf32>
    %84 = arith.truncf %83 : vector<8x16xf32> to vector<8x16xbf16>
    %85 = tpu.concatenate %81, %66 in 1 : vector<8x8xf32>, vector<8x8xf32> -> vector<8x16xf32>
    %86 = arith.truncf %85 : vector<8x16xf32> to vector<8x16xbf16>
    %87 = tpu.transpose %86, [1, 0] : vector<8x16xbf16> -> vector<16x8xbf16>
    %cst_36 = arith.constant dense<0.000000e+00> : vector<8x8xf32>
    %88 = tpu.matmul %84, %87, %cst_36 {dimension_numbers = #tpu.dot_dimension_numbers<[1], [0], [0], [1], [0, 0, 1, 1], [], []>} : vector<8x16xbf16>, vector<16x8xbf16>, vector<8x8xf32> -> vector<8x8xf32>
    %cst_37 = arith.constant 2.500000e-01 : f32
    %89 = vector.broadcast %cst_37 : f32 to vector<8x8xf32>
    %90 = arith.mulf %88, %89 : vector<8x8xf32>
    %cst_38 = arith.constant -1.000000e+30 : f32
    %91 = vector.broadcast %cst_38 : f32 to vector<8x8xf32>
    %92 = arith.select %69, %90, %91 : vector<8x8xi1>, vector<8x8xf32>
    %cst_39 = arith.constant dense<0xFF800000> : vector<8xf32>
    %93 = vector.multi_reduction <maximumf>, %92, %cst_39 [1] : vector<8x8xf32> to vector<8xf32>
    %94 = vector.shape_cast %93 : vector<8xf32> to vector<8x1xf32>
    %95 = vector.broadcast %94 : vector<8x1xf32> to vector<8x8xf32>
    %96 = arith.subf %92, %95 : vector<8x8xf32>
    %97 = math.exp %96 : vector<8x8xf32>
    %cst_40 = arith.constant dense<0.000000e+00> : vector<8xf32>
    %98 = vector.multi_reduction <add>, %97, %cst_40 [1] : vector<8x8xf32> to vector<8xf32>
    %99 = vector.shape_cast %98 : vector<8xf32> to vector<8x1xf32>
    %100 = tpu.reciprocal %99 {approx = true} : vector<8x1xf32> -> vector<8x1xf32>
    %101 = vector.broadcast %100 : vector<8x1xf32> to vector<8x8xf32>
    %102 = arith.mulf %97, %101 : vector<8x8xf32>
    %103 = arith.truncf %102 : vector<8x8xf32> to vector<8x8xbf16>
    %104 = arith.truncf %82 : vector<8x8xf32> to vector<8x8xbf16>
    %cst_41 = arith.constant dense<0.000000e+00> : vector<8x8xf32>
    %105 = tpu.matmul %103, %104, %cst_41 {dimension_numbers = #tpu.dot_dimension_numbers<[1], [0], [0], [1], [0, 0, 1, 1], [], []>} : vector<8x8xbf16>, vector<8x8xbf16>, vector<8x8xf32> -> vector<8x8xf32>
    %106 = vector.extract_strided_slice %37 {offsets = [0, 16], sizes = [8, 16], strides = [1, 1]} : vector<8x64xf32> to vector<8x16xf32>
    %107 = vector.extract_strided_slice %106 {offsets = [0, 0], sizes = [8, 8], strides = [1, 1]} : vector<8x16xf32> to vector<8x8xf32>
    %108 = vector.extract_strided_slice %106 {offsets = [0, 8], sizes = [8, 8], strides = [1, 1]} : vector<8x16xf32> to vector<8x8xf32>
    %109 = arith.mulf %108, %3 : vector<8x8xf32>
    %110 = vector.extract_strided_slice %108 {offsets = [0, 0], sizes = [8, 4], strides = [1, 1]} : vector<8x8xf32> to vector<8x4xf32>
    %111 = vector.extract_strided_slice %108 {offsets = [0, 4], sizes = [8, 4], strides = [1, 1]} : vector<8x8xf32> to vector<8x4xf32>
    %cst_42 = arith.constant 0.000000e+00 : f32
    %112 = vector.broadcast %cst_42 : f32 to vector<8x4xf32>
    %113 = arith.subf %112, %111 : vector<8x4xf32>
    %114 = tpu.concatenate %113, %110 in 1 : vector<8x4xf32>, vector<8x4xf32> -> vector<8x8xf32>
    %115 = arith.mulf %114, %5 : vector<8x8xf32>
    %116 = arith.addf %109, %115 : vector<8x8xf32>
    %117 = vector.extract_strided_slice %58 {offsets = [0, 16], sizes = [8, 8], strides = [1, 1]} : vector<8x64xf32> to vector<8x8xf32>
    %118 = vector.extract_strided_slice %58 {offsets = [0, 24], sizes = [8, 8], strides = [1, 1]} : vector<8x64xf32> to vector<8x8xf32>
    %119 = tpu.concatenate %107, %116 in 1 : vector<8x8xf32>, vector<8x8xf32> -> vector<8x16xf32>
    %120 = arith.truncf %119 : vector<8x16xf32> to vector<8x16xbf16>
    %121 = tpu.concatenate %117, %66 in 1 : vector<8x8xf32>, vector<8x8xf32> -> vector<8x16xf32>
    %122 = arith.truncf %121 : vector<8x16xf32> to vector<8x16xbf16>
    %123 = tpu.transpose %122, [1, 0] : vector<8x16xbf16> -> vector<16x8xbf16>
    %cst_43 = arith.constant dense<0.000000e+00> : vector<8x8xf32>
    %124 = tpu.matmul %120, %123, %cst_43 {dimension_numbers = #tpu.dot_dimension_numbers<[1], [0], [0], [1], [0, 0, 1, 1], [], []>} : vector<8x16xbf16>, vector<16x8xbf16>, vector<8x8xf32> -> vector<8x8xf32>
    %cst_44 = arith.constant 2.500000e-01 : f32
    %125 = vector.broadcast %cst_44 : f32 to vector<8x8xf32>
    %126 = arith.mulf %124, %125 : vector<8x8xf32>
    %cst_45 = arith.constant -1.000000e+30 : f32
    %127 = vector.broadcast %cst_45 : f32 to vector<8x8xf32>
    %128 = arith.select %69, %126, %127 : vector<8x8xi1>, vector<8x8xf32>
    %cst_46 = arith.constant dense<0xFF800000> : vector<8xf32>
    %129 = vector.multi_reduction <maximumf>, %128, %cst_46 [1] : vector<8x8xf32> to vector<8xf32>
    %130 = vector.shape_cast %129 : vector<8xf32> to vector<8x1xf32>
    %131 = vector.broadcast %130 : vector<8x1xf32> to vector<8x8xf32>
    %132 = arith.subf %128, %131 : vector<8x8xf32>
    %133 = math.exp %132 : vector<8x8xf32>
    %cst_47 = arith.constant dense<0.000000e+00> : vector<8xf32>
    %134 = vector.multi_reduction <add>, %133, %cst_47 [1] : vector<8x8xf32> to vector<8xf32>
    %135 = vector.shape_cast %134 : vector<8xf32> to vector<8x1xf32>
    %136 = tpu.reciprocal %135 {approx = true} : vector<8x1xf32> -> vector<8x1xf32>
    %137 = vector.broadcast %136 : vector<8x1xf32> to vector<8x8xf32>
    %138 = arith.mulf %133, %137 : vector<8x8xf32>
    %139 = arith.truncf %138 : vector<8x8xf32> to vector<8x8xbf16>
    %140 = arith.truncf %118 : vector<8x8xf32> to vector<8x8xbf16>
    %cst_48 = arith.constant dense<0.000000e+00> : vector<8x8xf32>
    %141 = tpu.matmul %139, %140, %cst_48 {dimension_numbers = #tpu.dot_dimension_numbers<[1], [0], [0], [1], [0, 0, 1, 1], [], []>} : vector<8x8xbf16>, vector<8x8xbf16>, vector<8x8xf32> -> vector<8x8xf32>
    %142 = vector.extract_strided_slice %37 {offsets = [0, 32], sizes = [8, 16], strides = [1, 1]} : vector<8x64xf32> to vector<8x16xf32>
    %143 = vector.extract_strided_slice %142 {offsets = [0, 0], sizes = [8, 8], strides = [1, 1]} : vector<8x16xf32> to vector<8x8xf32>
    %144 = vector.extract_strided_slice %142 {offsets = [0, 8], sizes = [8, 8], strides = [1, 1]} : vector<8x16xf32> to vector<8x8xf32>
    %145 = arith.mulf %144, %3 : vector<8x8xf32>
    %146 = vector.extract_strided_slice %144 {offsets = [0, 0], sizes = [8, 4], strides = [1, 1]} : vector<8x8xf32> to vector<8x4xf32>
    %147 = vector.extract_strided_slice %144 {offsets = [0, 4], sizes = [8, 4], strides = [1, 1]} : vector<8x8xf32> to vector<8x4xf32>
    %cst_49 = arith.constant 0.000000e+00 : f32
    %148 = vector.broadcast %cst_49 : f32 to vector<8x4xf32>
    %149 = arith.subf %148, %147 : vector<8x4xf32>
    %150 = tpu.concatenate %149, %146 in 1 : vector<8x4xf32>, vector<8x4xf32> -> vector<8x8xf32>
    %151 = arith.mulf %150, %5 : vector<8x8xf32>
    %152 = arith.addf %145, %151 : vector<8x8xf32>
    %153 = vector.extract_strided_slice %58 {offsets = [0, 32], sizes = [8, 8], strides = [1, 1]} : vector<8x64xf32> to vector<8x8xf32>
    %154 = vector.extract_strided_slice %58 {offsets = [0, 40], sizes = [8, 8], strides = [1, 1]} : vector<8x64xf32> to vector<8x8xf32>
    %155 = tpu.concatenate %143, %152 in 1 : vector<8x8xf32>, vector<8x8xf32> -> vector<8x16xf32>
    %156 = arith.truncf %155 : vector<8x16xf32> to vector<8x16xbf16>
    %157 = tpu.concatenate %153, %66 in 1 : vector<8x8xf32>, vector<8x8xf32> -> vector<8x16xf32>
    %158 = arith.truncf %157 : vector<8x16xf32> to vector<8x16xbf16>
    %159 = tpu.transpose %158, [1, 0] : vector<8x16xbf16> -> vector<16x8xbf16>
    %cst_50 = arith.constant dense<0.000000e+00> : vector<8x8xf32>
    %160 = tpu.matmul %156, %159, %cst_50 {dimension_numbers = #tpu.dot_dimension_numbers<[1], [0], [0], [1], [0, 0, 1, 1], [], []>} : vector<8x16xbf16>, vector<16x8xbf16>, vector<8x8xf32> -> vector<8x8xf32>
    %cst_51 = arith.constant 2.500000e-01 : f32
    %161 = vector.broadcast %cst_51 : f32 to vector<8x8xf32>
    %162 = arith.mulf %160, %161 : vector<8x8xf32>
    %cst_52 = arith.constant -1.000000e+30 : f32
    %163 = vector.broadcast %cst_52 : f32 to vector<8x8xf32>
    %164 = arith.select %69, %162, %163 : vector<8x8xi1>, vector<8x8xf32>
    %cst_53 = arith.constant dense<0xFF800000> : vector<8xf32>
    %165 = vector.multi_reduction <maximumf>, %164, %cst_53 [1] : vector<8x8xf32> to vector<8xf32>
    %166 = vector.shape_cast %165 : vector<8xf32> to vector<8x1xf32>
    %167 = vector.broadcast %166 : vector<8x1xf32> to vector<8x8xf32>
    %168 = arith.subf %164, %167 : vector<8x8xf32>
    %169 = math.exp %168 : vector<8x8xf32>
    %cst_54 = arith.constant dense<0.000000e+00> : vector<8xf32>
    %170 = vector.multi_reduction <add>, %169, %cst_54 [1] : vector<8x8xf32> to vector<8xf32>
    %171 = vector.shape_cast %170 : vector<8xf32> to vector<8x1xf32>
    %172 = tpu.reciprocal %171 {approx = true} : vector<8x1xf32> -> vector<8x1xf32>
    %173 = vector.broadcast %172 : vector<8x1xf32> to vector<8x8xf32>
    %174 = arith.mulf %169, %173 : vector<8x8xf32>
    %175 = arith.truncf %174 : vector<8x8xf32> to vector<8x8xbf16>
    %176 = arith.truncf %154 : vector<8x8xf32> to vector<8x8xbf16>
    %cst_55 = arith.constant dense<0.000000e+00> : vector<8x8xf32>
    %177 = tpu.matmul %175, %176, %cst_55 {dimension_numbers = #tpu.dot_dimension_numbers<[1], [0], [0], [1], [0, 0, 1, 1], [], []>} : vector<8x8xbf16>, vector<8x8xbf16>, vector<8x8xf32> -> vector<8x8xf32>
    %178 = vector.extract_strided_slice %37 {offsets = [0, 48], sizes = [8, 16], strides = [1, 1]} : vector<8x64xf32> to vector<8x16xf32>
    %179 = vector.extract_strided_slice %178 {offsets = [0, 0], sizes = [8, 8], strides = [1, 1]} : vector<8x16xf32> to vector<8x8xf32>
    %180 = vector.extract_strided_slice %178 {offsets = [0, 8], sizes = [8, 8], strides = [1, 1]} : vector<8x16xf32> to vector<8x8xf32>
    %181 = arith.mulf %180, %3 : vector<8x8xf32>
    %182 = vector.extract_strided_slice %180 {offsets = [0, 0], sizes = [8, 4], strides = [1, 1]} : vector<8x8xf32> to vector<8x4xf32>
    %183 = vector.extract_strided_slice %180 {offsets = [0, 4], sizes = [8, 4], strides = [1, 1]} : vector<8x8xf32> to vector<8x4xf32>
    %cst_56 = arith.constant 0.000000e+00 : f32
    %184 = vector.broadcast %cst_56 : f32 to vector<8x4xf32>
    %185 = arith.subf %184, %183 : vector<8x4xf32>
    %186 = tpu.concatenate %185, %182 in 1 : vector<8x4xf32>, vector<8x4xf32> -> vector<8x8xf32>
    %187 = arith.mulf %186, %5 : vector<8x8xf32>
    %188 = arith.addf %181, %187 : vector<8x8xf32>
    %189 = vector.extract_strided_slice %58 {offsets = [0, 48], sizes = [8, 8], strides = [1, 1]} : vector<8x64xf32> to vector<8x8xf32>
    %190 = vector.extract_strided_slice %58 {offsets = [0, 56], sizes = [8, 8], strides = [1, 1]} : vector<8x64xf32> to vector<8x8xf32>
    %191 = tpu.concatenate %179, %188 in 1 : vector<8x8xf32>, vector<8x8xf32> -> vector<8x16xf32>
    %192 = arith.truncf %191 : vector<8x16xf32> to vector<8x16xbf16>
    %193 = tpu.concatenate %189, %66 in 1 : vector<8x8xf32>, vector<8x8xf32> -> vector<8x16xf32>
    %194 = arith.truncf %193 : vector<8x16xf32> to vector<8x16xbf16>
    %195 = tpu.transpose %194, [1, 0] : vector<8x16xbf16> -> vector<16x8xbf16>
    %cst_57 = arith.constant dense<0.000000e+00> : vector<8x8xf32>
    %196 = tpu.matmul %192, %195, %cst_57 {dimension_numbers = #tpu.dot_dimension_numbers<[1], [0], [0], [1], [0, 0, 1, 1], [], []>} : vector<8x16xbf16>, vector<16x8xbf16>, vector<8x8xf32> -> vector<8x8xf32>
    %cst_58 = arith.constant 2.500000e-01 : f32
    %197 = vector.broadcast %cst_58 : f32 to vector<8x8xf32>
    %198 = arith.mulf %196, %197 : vector<8x8xf32>
    %cst_59 = arith.constant -1.000000e+30 : f32
    %199 = vector.broadcast %cst_59 : f32 to vector<8x8xf32>
    %200 = arith.select %69, %198, %199 : vector<8x8xi1>, vector<8x8xf32>
    %cst_60 = arith.constant dense<0xFF800000> : vector<8xf32>
    %201 = vector.multi_reduction <maximumf>, %200, %cst_60 [1] : vector<8x8xf32> to vector<8xf32>
    %202 = vector.shape_cast %201 : vector<8xf32> to vector<8x1xf32>
    %203 = vector.broadcast %202 : vector<8x1xf32> to vector<8x8xf32>
    %204 = arith.subf %200, %203 : vector<8x8xf32>
    %205 = math.exp %204 : vector<8x8xf32>
    %cst_61 = arith.constant dense<0.000000e+00> : vector<8xf32>
    %206 = vector.multi_reduction <add>, %205, %cst_61 [1] : vector<8x8xf32> to vector<8xf32>
    %207 = vector.shape_cast %206 : vector<8xf32> to vector<8x1xf32>
    %208 = tpu.reciprocal %207 {approx = true} : vector<8x1xf32> -> vector<8x1xf32>
    %209 = vector.broadcast %208 : vector<8x1xf32> to vector<8x8xf32>
    %210 = arith.mulf %205, %209 : vector<8x8xf32>
    %211 = arith.truncf %210 : vector<8x8xf32> to vector<8x8xbf16>
    %212 = arith.truncf %190 : vector<8x8xf32> to vector<8x8xbf16>
    %cst_62 = arith.constant dense<0.000000e+00> : vector<8x8xf32>
    %213 = tpu.matmul %211, %212, %cst_62 {dimension_numbers = #tpu.dot_dimension_numbers<[1], [0], [0], [1], [0, 0, 1, 1], [], []>} : vector<8x8xbf16>, vector<8x8xbf16>, vector<8x8xf32> -> vector<8x8xf32>
    %214 = tpu.concatenate %105, %141, %177, %213 in 1 : vector<8x8xf32>, vector<8x8xf32>, vector<8x8xf32>, vector<8x8xf32> -> vector<8x32xf32>
    %c0_63 = arith.constant 0 : index
    %c0_64 = arith.constant 0 : index
    %215 = vector.load %arg11[%c0_63, %c0_64] : memref<32x32xbf16, #tpu.memory_space<vmem>>, vector<32x32xbf16>
    %216 = arith.truncf %214 : vector<8x32xf32> to vector<8x32xbf16>
    %cst_65 = arith.constant dense<0.000000e+00> : vector<8x32xf32>
    %217 = tpu.matmul %216, %215, %cst_65 {dimension_numbers = #tpu.dot_dimension_numbers<[1], [0], [0], [1], [0, 0, 1, 1], [], []>} : vector<8x32xbf16>, vector<32x32xbf16>, vector<8x32xf32> -> vector<8x32xf32>
    %218 = arith.addf %1, %217 : vector<8x32xf32>
    %c0_66 = arith.constant 0 : index
    %c0_67 = arith.constant 0 : index
    %219 = vector.load %arg12[%c0_66, %c0_67] : memref<1x32xf32, #tpu.memory_space<vmem>>, vector<1x32xf32>
    %220 = arith.mulf %218, %218 : vector<8x32xf32>
    %cst_68 = arith.constant dense<0.000000e+00> : vector<8xf32>
    %221 = vector.multi_reduction <add>, %220, %cst_68 [1] : vector<8x32xf32> to vector<8xf32>
    %222 = vector.shape_cast %221 : vector<8xf32> to vector<8x1xf32>
    %cst_69 = arith.constant 3.200000e+01 : f32
    %223 = vector.broadcast %cst_69 : f32 to vector<8x1xf32>
    %224 = arith.divf %222, %223 : vector<8x1xf32>
    %cst_70 = arith.constant 9.99999997E-7 : f32
    %225 = vector.broadcast %cst_70 : f32 to vector<8x1xf32>
    %226 = arith.addf %224, %225 : vector<8x1xf32>
    %227 = math.rsqrt %226 : vector<8x1xf32>
    %228 = vector.broadcast %227 : vector<8x1xf32> to vector<8x32xf32>
    %229 = arith.mulf %218, %228 : vector<8x32xf32>
    %230 = vector.broadcast %219 : vector<1x32xf32> to vector<8x32xf32>
    %231 = arith.mulf %229, %230 : vector<8x32xf32>
    %c0_71 = arith.constant 0 : index
    %c0_72 = arith.constant 0 : index
    %232 = vector.load %arg13[%c0_71, %c0_72] : memref<32x64xbf16, #tpu.memory_space<vmem>>, vector<32x64xbf16>
    %233 = arith.truncf %231 : vector<8x32xf32> to vector<8x32xbf16>
    %cst_73 = arith.constant dense<0.000000e+00> : vector<8x64xf32>
    %234 = tpu.matmul %233, %232, %cst_73 {dimension_numbers = #tpu.dot_dimension_numbers<[1], [0], [0], [1], [0, 0, 1, 1], [], []>} : vector<8x32xbf16>, vector<32x64xbf16>, vector<8x64xf32> -> vector<8x64xf32>
    %c0_74 = arith.constant 0 : index
    %c0_75 = arith.constant 0 : index
    %235 = vector.load %arg14[%c0_74, %c0_75] : memref<32x64xbf16, #tpu.memory_space<vmem>>, vector<32x64xbf16>
    %236 = arith.truncf %231 : vector<8x32xf32> to vector<8x32xbf16>
    %cst_76 = arith.constant dense<0.000000e+00> : vector<8x64xf32>
    %237 = tpu.matmul %236, %235, %cst_76 {dimension_numbers = #tpu.dot_dimension_numbers<[1], [0], [0], [1], [0, 0, 1, 1], [], []>} : vector<8x32xbf16>, vector<32x64xbf16>, vector<8x64xf32> -> vector<8x64xf32>
    %238 = arith.negf %234 : vector<8x64xf32>
    %239 = math.exp %238 : vector<8x64xf32>
    %cst_77 = arith.constant 1.000000e+00 : f32
    %240 = vector.broadcast %cst_77 : f32 to vector<8x64xf32>
    %241 = arith.addf %240, %239 : vector<8x64xf32>
    %242 = arith.divf %240, %241 : vector<8x64xf32>
    %243 = arith.mulf %234, %242 : vector<8x64xf32>
    %244 = arith.mulf %243, %237 : vector<8x64xf32>
    %c0_78 = arith.constant 0 : index
    %c0_79 = arith.constant 0 : index
    %245 = vector.load %arg15[%c0_78, %c0_79] : memref<64x32xbf16, #tpu.memory_space<vmem>>, vector<64x32xbf16>
    %246 = arith.truncf %244 : vector<8x64xf32> to vector<8x64xbf16>
    %cst_80 = arith.constant dense<0.000000e+00> : vector<8x32xf32>
    %247 = tpu.matmul %246, %245, %cst_80 {dimension_numbers = #tpu.dot_dimension_numbers<[1], [0], [0], [1], [0, 0, 1, 1], [], []>} : vector<8x64xbf16>, vector<64x32xbf16>, vector<8x32xf32> -> vector<8x32xf32>
    %248 = arith.addf %218, %247 : vector<8x32xf32>
    %c0_81 = arith.constant 0 : index
    %c0_82 = arith.constant 0 : index
    %c0_83 = arith.constant 0 : index
    %249 = vector.load %arg16[%c0_81, %c0_82, %c0_83] : memref<1x8x32xf32, #tpu.memory_space<vmem>>, vector<1x8x32xf32>
    %250 = vector.shape_cast %249 : vector<1x8x32xf32> to vector<8x32xf32>
    %251 = vector.shape_cast %248 : vector<8x32xf32> to vector<1x8x32xf32>
    tpu.vector_store %arg16[%c0_81, %c0_82, %c0_83], %251 {strides = array<i32>} : memref<1x8x32xf32, #tpu.memory_space<vmem>>, vector<1x8x32xf32>,
    return
  }
  func.func @transform_0(%arg0: i32) -> (i32, i32, i32) {
    %c0_i32 = arith.constant 0 : i32
    %c0_i32_0 = arith.constant 0 : i32
    %c0_i32_1 = arith.constant 0 : i32
    return %arg0, %c0_i32, %c0_i32_0 : i32, i32, i32
  }
  func.func @transform_1(%arg0: i32) -> (i32, i32, i32) {
    %c0_i32 = arith.constant 0 : i32
    %c0_i32_0 = arith.constant 0 : i32
    %c0_i32_1 = arith.constant 0 : i32
    return %arg0, %c0_i32, %c0_i32_0 : i32, i32, i32
  }
  func.func @transform_2(%arg0: i32) -> (i32, i32, i32) {
    %c0_i32 = arith.constant 0 : i32
    %c0_i32_0 = arith.constant 0 : i32
    %c0_i32_1 = arith.constant 0 : i32
    return %arg0, %c0_i32, %c0_i32_0 : i32, i32, i32
  }
  func.func @transform_3(%arg0: i32) -> (i32, i32) {
    %c0_i32 = arith.constant 0 : i32
    %c0_i32_0 = arith.constant 0 : i32
    %c0_i32_1 = arith.constant 0 : i32
    return %c0_i32, %c0_i32_0 : i32, i32
  }
  func.func @transform_4(%arg0: i32) -> (i32, i32) {
    %c0_i32 = arith.constant 0 : i32
    %c0_i32_0 = arith.constant 0 : i32
    %c0_i32_1 = arith.constant 0 : i32
    return %c0_i32, %c0_i32_0 : i32, i32
  }
  func.func @transform_5(%arg0: i32) -> (i32, i32) {
    %c0_i32 = arith.constant 0 : i32
    %c0_i32_0 = arith.constant 0 : i32
    %c0_i32_1 = arith.constant 0 : i32
    return %c0_i32, %c0_i32_0 : i32, i32
  }
  func.func @transform_6(%arg0: i32) -> (i32, i32) {
    %c0_i32 = arith.constant 0 : i32
    %c0_i32_0 = arith.constant 0 : i32
    %c0_i32_1 = arith.constant 0 : i32
    return %c0_i32, %c0_i32_0 : i32, i32
  }
  func.func @transform_7(%arg0: i32) -> (i32, i32) {
    %c0_i32 = arith.constant 0 : i32
    %c0_i32_0 = arith.constant 0 : i32
    %c0_i32_1 = arith.constant 0 : i32
    return %c0_i32, %c0_i32_0 : i32, i32
  }
  func.func @transform_8(%arg0: i32) -> (i32, i32) {
    %c0_i32 = arith.constant 0 : i32
    %c0_i32_0 = arith.constant 0 : i32
    %c0_i32_1 = arith.constant 0 : i32
    return %c0_i32, %c0_i32_0 : i32, i32
  }
  func.func @transform_9(%arg0: i32) -> (i32, i32) {
    %c0_i32 = arith.constant 0 : i32
    %c0_i32_0 = arith.constant 0 : i32
    %c0_i32_1 = arith.constant 0 : i32
    return %c0_i32, %c0_i32_0 : i32, i32
  }
  func.func @transform_10(%arg0: i32) -> (i32, i32) {
    %c0_i32 = arith.constant 0 : i32
    %c0_i32_0 = arith.constant 0 : i32
    %c0_i32_1 = arith.constant 0 : i32
    return %c0_i32, %c0_i32_0 : i32, i32
  }
  func.func @transform_11(%arg0: i32) -> (i32, i32) {
    %c0_i32 = arith.constant 0 : i32
    %c0_i32_0 = arith.constant 0 : i32
    %c0_i32_1 = arith.constant 0 : i32
    return %c0_i32, %c0_i32_0 : i32, i32
  }
  func.func @transform_12(%arg0: i32) -> (i32, i32) {
    %c0_i32 = arith.constant 0 : i32
    %c0_i32_0 = arith.constant 0 : i32
    %c0_i32_1 = arith.constant 0 : i32
    return %c0_i32, %c0_i32_0 : i32, i32
  }
  func.func @transform_13(%arg0: i32) -> (i32, i32) {
    %c0_i32 = arith.constant 0 : i32
    %c0_i32_0 = arith.constant 0 : i32
    %c0_i32_1 = arith.constant 0 : i32
    return %c0_i32, %c0_i32_0 : i32, i32
  }
  func.func @transform_14(%arg0: i32) -> (i32, i32) {
    %c0_i32 = arith.constant 0 : i32
    %c0_i32_0 = arith.constant 0 : i32
    %c0_i32_1 = arith.constant 0 : i32
    return %c0_i32, %c0_i32_0 : i32, i32
  }
  func.func @transform_15(%arg0: i32) -> (i32, i32, i32) {
    %c0_i32 = arith.constant 0 : i32
    %c0_i32_0 = arith.constant 0 : i32
    %c0_i32_1 = arith.constant 0 : i32
    return %arg0, %c0_i32, %c0_i32_0 : i32, i32, i32
  }
}

</mosaic_0001>

<bundles_post_ra>
// kernel: tpu_custom_call.1
= control target key start
LH: loop header
LB: loop body
LE: loop exit
PB: predicated region body
PF: predicated region fallthrough
CT: control target
= control target key end

     0   :  { %s2543_s0 = inlined_call_operand.vmem [shape: f32[2,8,32], index: 0, kind: input, shape index: {}]   ;;  %s2544_s1 = inlined_call_operand.vmem [shape: f32[2,8,8], index: 1, kind: input, shape index: {}]   ;;  %s2545_s2 = inlined_call_operand.vmem [shape: f32[2,8,8], index: 2, kind: input, shape index: {}]   ;;  %s2546_s3 = inlined_call_operand.vmem [shape: f32[1,32], index: 3, kind: input, shape index: {}]   ;;  %s2547_s4 = inlined_call_operand.vmem [shape: bf16[32,16], index: 4, kind: input, shape index: {}]   ;;  %s2548_s5 = inlined_call_operand.hbm [shape: f32[1,16], index: 5, kind: input, shape index: {}]   ;;  %s2549_s6 = inlined_call_operand.hbm [shape: bf16[16,64], index: 6, kind: input, shape index: {}]   ;;  %s2550_s7 = inlined_call_operand.vmem [shape: bf16[32,24], index: 7, kind: input, shape index: {}]   ;;  %s2551_s8 = inlined_call_operand.hbm [shape: f32[1,16], index: 8, kind: input, shape index: {}]   ;;  %s2552_s9 = inlined_call_operand.hbm [shape: bf16[16,64], index: 9, kind: input, shape index: {}]   ;;  %s2553_s10 = inlined_call_operand.vmem [shape: bf16[32,32], index: 10, kind: input, shape index: {}]   ;;  %s2554_s11 = inlined_call_operand.hbm [shape: f32[1,32], index: 11, kind: input, shape index: {}]   ;;  %s2555_s12 = inlined_call_operand.vmem [shape: bf16[32,64], index: 12, kind: input, shape index: {}]   ;;  %s2556_s13 = inlined_call_operand.hbm [shape: bf16[32,64], index: 13, kind: input, shape index: {}]   ;;  %s2557_s14 = inlined_call_operand.vmem [shape: bf16[64,32], index: 14, kind: input, shape index: {}]   ;;  %s2558_s15 = inlined_call_operand.hbm [shape: f32[2,8,32], index: 15, kind: output, shape index: {}]  }
   0x1   :  { %2568 = sst [smem:[#allocation26_spill]] %s2548_s5 }
   0x2   :  { %2569 = sst [smem:[#allocation27_spill]] %s2549_s6 }
   0x3   :  { %2570 = sst [smem:[#allocation28_spill]] %s2552_s9 }
   0x4   :  { %2571 = sst [smem:[#allocation29_spill]] %s2558_s15 }
   0x5   :  { %20 = vsyncpa [#allocation3], 0 }
   0x6   :  { %21 = vsyncpa [#allocation6], 0 }
   0x7   :  { %22 = vsyncpa [#allocation9], 0 }
   0x8   :  { %23 = vsyncpa [#allocation12], 0 }
   0x9   :  { %24 = vsyncpa [#allocation4], 0 }
   0xa   :  { %26 = vsyncpa [#allocation4 + $0x1], 0  ;;  %s2217_s18 = smov 0   ;;  %s2219_s19 = smov 0  }
   0xb   :  { %s2221_s20 = smov 0   ;;  %s2223_s21 = smov 0  }
   0xc LB: > { %2572 = sst [smem:[#allocation19_spill]] %s2093_s18  ;;  %s2238_s22 = sadd.s32 4294967295, %s2105_s21   ;;  %s2105_s21 = sphi %s2223_s21, %s2591_s21   ;;  %s2101_s20 = sphi %s2221_s20, %s2593_s20   ;;  %s2097_s19 = sphi %s2219_s19, %s2595_s19   ;;  %s2093_s18 = sphi %s2217_s18, %s2594_s18  }
   0xd   : > { %2573 = sst [smem:[#allocation20_spill]] %s2101_s20  ;;  %s1551_s23 = sadd.s32 4294967294, %s2105_s21  }
   0xe   : > { %2574 = sst [smem:[#allocation21_spill]] %s2105_s21  ;;  %s2242_s24 = sadd.s32 1, %s2105_s21  }
   0xf   : > { %2575 = sst [smem:[#allocation22_spill]] %s2242_s24  ;;  %s369_s25 = sadd.s32 1, %s2101_s20 }
  0x10   : > { %s366_s26 = ssub.s32 %s2105_s21, %s2242_s24  ;;  %p379_p0 = scmp.ne.s32.totalorder %s2101_s20, %s2097_s19 }
  0x11   : > { %p367_p1 = scmp.eq.s32.totalorder %s366_s26, 0  ;;  %p380_p2 = scmp.eq.s32.totalorder %s2238_s22, 1 }
  0x12   : > { %p385_p3 = scmp.ne.s32.totalorder %s2097_s19, %s2093_s18  ;;  %p386_p4 = scmp.eq.s32.totalorder %s1551_s23, 1 }
  0x13   : > { %s2253_s27 = scalar_select %p367_p1, %s2101_s20, %s369_s25  }
  0x14   : > { %p2255_p5 = por %p380_p2, %p379_p0  ;;  %p2259_p6 = por %p386_p4, %p385_p3 }
  0x15   : > { %2576 = sst [smem:[#allocation23_spill]] %s2253_s27  ;;  %p1552_p7 = scmp.ge.s32.totalorder %s2105_s21, 1 }
  0x16   : > { %s2577_s28 = scalar_select %p2255_p5, 1, 0 }
  0x17   : > { %s2579_s29 = scalar_select %p2259_p6, 1, 0 }
  0x18   : > { %2578 = sst [smem:[#allocation24_spill]] %s2577_s28  ;;  %p393_p8 = scmp.lt.s32.totalorder %s2105_s21, 3 }
  0x19   : > { %2580 = sst [smem:[#allocation25_spill]] %s2579_s29  ;;  %p1721_p9 = scmp.eq.s32.totalorder %s2238_s22, 0 }
  0x1a   : > { %p2266_p10 = pnand %p1552_p7, %p393_p8  ;;  %s2582_s6 = sld [smem:[#allocation27_spill]] }
  0x1b   : > { %s2107_s25 = smov [#allocation5]   ;;  %s2584_s9 = sld [smem:[#allocation28_spill]] }
  0x1c   : > { %p1698_p11 = pneg %p2266_p10  ;;  %s424_s26 = sshll.u32 %s2107_s25, 4  ;;  %s425_s26 = int_to_ptr.vmem [resolvable:$true] %s424_s26 }
  0x1d   : > { %s2108_s16 = smov 64   ;;  %s2109_s17 = smov 4  }
  0x1e   : > { %p2277_p12 = pnand %p1721_p9, %p1698_p11  ;;  %s2110_s25 = smov [#allocation8]  }
  0x1f   : > { %s2585_s5 = sld [smem:[#allocation26_spill]]  ;;  %s2111_s28 = smov [#allocation2]  }
  0x20   : > { %s422_s23 = sshll.u32 %s2582_s6, 4  ;;  %s453_s6 = sshll.u32 %s2110_s25, 4  ;;  %s423_s23 = int_to_ptr.hbm [resolvable:$true] %s422_s23  ;;  %s454_s6 = int_to_ptr.vmem [resolvable:$true] %s453_s6 }
  0x21   : > { %s451_s29 = sshll.u32 %s2584_s9, 4  ;;  %s440_s9 = sshll.u32 %s2551_s8, 4  ;;  %s452_s29 = int_to_ptr.hbm [resolvable:$true] %s451_s29  ;;  %s441_s9 = int_to_ptr.hbm [resolvable:$true] %s440_s9 }
  0x22   : > { %1704 = dma.hbm_to_vmem [thread:$0]  (!%p2277_p12), %s423_s23, 128, %s425_s26, [#allocation6], %s2108_s16, %s2108_s16, %s2109_s17  }
  0x23   : > { %1710 = dma.hbm_to_vmem [thread:$0]  (!%p2277_p12), %s452_s29, 128, %s454_s6, [#allocation9], %s2108_s16, %s2108_s16, %s2109_s17  }
  0x24   : > { %s413_s23 = sshll.u32 %s2111_s28, 4  ;;  %s2112_s18 = smov [#allocation7]   ;;  %s414_s23 = int_to_ptr.vmem [resolvable:$true] %s413_s23 }
  0x25   : > { %s411_s15 = sshll.u32 %s2585_s5, 4  ;;  %s442_s21 = sshll.u32 %s2112_s18, 4  ;;  %s412_s15 = int_to_ptr.hbm [resolvable:$true] %s411_s15  ;;  %s443_s21 = int_to_ptr.vmem [resolvable:$true] %s442_s21 }
  0x26   : > { %1701 = dma.hbm_to_vmem [thread:$0]  (!%p2277_p12), %s412_s15, 16, %s414_s23, [#allocation3]  }
  0x27   : > { %s469_s5 = sshll.u32 %s2554_s11, 4  ;;  %s483_s20 = sshll.u32 %s2556_s13, 4  ;;  %s470_s5 = int_to_ptr.hbm [resolvable:$true] %s469_s5  ;;  %s484_s20 = int_to_ptr.hbm [resolvable:$true] %s483_s20 }
  0x28   : > { %1707 = dma.hbm_to_vmem [thread:$0]  (!%p2277_p12), %s441_s9, 16, %s443_s21, [#allocation6]  }
  0x29   : > { %s2113_s28 = smov [#allocation10]   ;;  %s2114_s15 = smov [#allocation11]  }
  0x2a   : > { %s471_s24 = sshll.u32 %s2113_s28, 4  ;;  %s485_s23 = sshll.u32 %s2114_s15, 4  ;;  %s472_s24 = int_to_ptr.vmem [resolvable:$true] %s471_s24  ;;  %s486_s23 = int_to_ptr.vmem [resolvable:$true] %s485_s23 }
  0x2b   : > { %1713 = dma.hbm_to_vmem [thread:$0]  (!%p2277_p12), %s470_s5, 16, %s472_s24, [#allocation9]  }
  0x2c   : > { %1716 = dma.hbm_to_vmem [thread:$0]  (!%p2277_p12), %s484_s20, 256, %s486_s23, [#allocation12], %s2108_s16, %s2108_s16, %s2109_s17  }
  0x2d   : > { %525 = sbr.rel (%p2266_p10) target bundleno = 2200 (0x898), region = 80 }
  0x32   : > { %2072 = dma.done.wait (%p1721_p9), [#allocation3], 16  }
  0x33   : > { %2074 = vsyncadd (%p1721_p9), [#allocation3], 4294967280 }
  0x34   : > { %2076 = dma.done.wait (%p1721_p9), [#allocation6], 144  }
  0x35   : > { %2078 = vsyncadd (%p1721_p9), [#allocation6], 4294967152 }
  0x36   : > { %2080 = dma.done.wait (%p1721_p9), [#allocation9], 144  }
  0x37   : > { %2082 = vsyncadd (%p1721_p9), [#allocation9], 4294967152 }
  0x38   : > { %2084 = dma.done.wait (%p1721_p9), [#allocation12], 256  }
  0x39   : > { %2086 = vsyncadd (%p1721_p9), [#allocation12], 4294967040  ;;  %p606_p13 = scmp.lt.s32.totalorder %s2238_s22, 1  ;;  %vm624_vm0 = vcmask 261120   ;;  %v2115_v3 = vmov 32.0   ;;  %v1657_v7 = vld [vmem:[%s2547_s4 + $0x8] sm:$0xff] }
  0x3a   : > { %1815 = vrcp.f32 %v2115_v3  ;;  %v1660_v8 = vld [vmem:[%s2550_s7 + $0x8] sm:$0xff]  ;;  %678 = vmatpush.bf16.msra.mxu0 %v1657_v7  ;;  %v1656_v10 = vld [vmem:[%s2547_s4] sm:$0xff]  ;;  %vm687_vm5 = vcmask 130048   ;;  %s2116_s15 = smov 116   ;;  %s2117_s23 = smov 108   ;;  %v2118_v37 = vmov 16.0  }
  0x3b   : > { %s607_s5 = scalar_select %p606_p13, %s2238_s22, 1  ;;  %762 = vmatpush.bf16.msra.mxu2 %v1660_v8  ;;  %v1659_v11 = vld [vmem:[%s2550_s7] sm:$0xff]  ;;  %v1661_v45 = vld [vmem:[#allocation8] sm:$0xff]  ;;  %vm830_vm13 = vcmask 31744   ;;  %vm863_vm14 = vcmask 64512  }
  0x3c   : > { %v1811_v23 = vld [vmem:[%s2546_s3] ss:$0 sm:$0xff]  ;;  %v1658_v42 = vld [vmem:[#allocation5] sm:$0xff]  ;;  %810 = vmatpush.bf16.msra.mxu3 %v1661_v45  ;;  %s2120_s27 = smov 92   ;;  %s2121_s18 = smov 100  }
  0x3d   : > { %s2337_s9 = sshll.u32 %s607_s5, 3  ;;  %734 = vmatpush.bf16.msra.mxu1 %v1658_v42  ;;  %v1812_v61 = vld [vmem:[#allocation2] ss:$0 sm:$0xff]  ;;  %s2119_s5 = smov 76  }
  0x3e   : > { %s609_s16 = scalar_lea.vmem %s2543_s0, %s2337_s9  ;;  %679 = vmatpush.bf16.msra.mxu0 %v1656_v10  ;;  %s613_s17 = scalar_lea.vmem %s2544_s1, %s2337_s9 }
  0x3f   : > { %v2343_v0 = vld [vmem:[%s609_s16] sm:$0xff]  ;;  %763 = vmatpush.bf16.msra.mxu2 %v1659_v11  ;;  %s2122_s21 = smov 16   ;;  %s2123_s26 = smov 84  }
  0x40   : > { %v623_v1 = vmul.f32 %v2343_v0, %v2343_v0  ;;  %v1816_v4 = vpop.eup %1815  ;;  %s2124_s25 = smov 124   ;;  %s617_s20 = scalar_lea.vmem %s2545_s2, %s2337_s9 }
  0x41   : > { %v629_v5 = vmul.f32 32.0, %v1816_v4  ;;  %vm633_vm1 = vweird.f32 %v1816_v4  ;;  %s2125_s28 = smov 68   ;;  %s2126_s24 = smov 40  }
  0x42   : > { %v625_v2 = vsel %vm624_vm0, %v623_v1, 0.0  ;;  %s2129_s9 = smov 8   ;;  %s2132_s30 = smov 112  }
  0x43   : > { %626 = vadd.xlane.f32.xlu0 %v625_v2  ;;  %v630_v6 = vsub.f32 1.0, %v629_v5  ;;  %s2133_s16 = smov 80  }
  0x45   : > { %v631_v9 = vmul.f32 %v1816_v4, %v630_v6  ;;  %v1813_v6 = vld [vmem:[#allocation7] ss:$0 sm:$0xff] }
  0x47   : > { %v632_v12 = vadd.f32 %v1816_v4, %v631_v9 }
  0x49   : > { %v2360_v13 = vsel %vm633_vm1, %v1816_v4, %v632_v12  ;;  %v620_v12 = vld [vmem:[%s613_s17] sm:$0xff]  ;;  %s2134_s17 = smov 104   ;;  %vm912_vm1 = vcmask 1043456  }
  0xb6   : > { %v627_v14 = vpop.xlane.xlu0 %626 }
  0xb7   : > { %v635_v15 = vmul.f32 %v2360_v13, %v627_v14 }
  0xb9   : > { %v636_v16 = vadd.f32 1e-06, %v635_v15 }
  0xbb   : > { %1817 = vrsqrt.f32 %v636_v16  ;;  %vm643_vm3 = vweird.f32 %v636_v16 }
  0xbc   : > { %1819 = vrcp.f32 %v2118_v37 }
  0xc1   : > { %v1818_v17 = vpop.eup %1817 }
  0xc2   : > { %v638_v18 = vmul.f32 %v1818_v17, %v636_v16  ;;  %vm644_vm2 = vweird.f32 %v1818_v17  ;;  %v1820_v38 = vpop.eup %1819 }
  0xc3   : > { %vm645_vm4 = vmor %vm643_vm3, %vm644_vm2  ;;  %v692_v39 = vmul.f32 16.0, %v1820_v38  ;;  %vm696_vm6 = vweird.f32 %v1820_v38  ;;  %vm1199_vm2 = vcmask 195584  }
  0xc4   : > { %v639_v19 = vmul.f32 %v1818_v17, %v638_v18 }
  0xc5   : > { %v693_v40 = vsub.f32 1.0, %v692_v39 }
  0xc6   : > { %v640_v20 = vmul.f32 0.5, %v639_v19 }
  0xc7   : > { %v694_v41 = vmul.f32 %v1820_v38, %v693_v40 }
  0xc8   : > { %v641_v21 = vsub.f32 1.5, %v640_v20  ;;  %v621_v20 = vld [vmem:[%s617_s20] sm:$0xff] }
  0xc9   : > { %v695_v43 = vadd.f32 %v1820_v38, %v694_v41 }
  0xca   : > { %v642_v22 = vmul.f32 %v1818_v17, %v641_v21 }
  0xcb   : > { %v697_v44 = vsel %vm696_vm6, %v1820_v38, %v695_v43 }
  0xcc   : > { %v646_v24 = vsel %vm645_vm4, %v1818_v17, %v642_v22 }
  0xcd   : > { %v647_v25 = vmul.f32 %v646_v24, %v2343_v0 }
  0xcf   : > { %v651_v26 = vmul.f32 %v1811_v23, %v647_v25 }
  0xd1   : > { %v656_v27 = vpack.c.bf16 %v651_v26, %v651_v26 }
  0xd3   : > { %1579 = vmatmul.msk.bf16.vlgmr.msra.gmra.mxu0 %vm624_vm0, %v656_v27  ;;  %1593 = vmatmul.msk.bf16.vlgmr.msra.gmra.mxu2 %vm624_vm0, %v656_v27 }
 0x150   : > { %v681_v28 = vpop.f32.mrf.mxu0 }
 0x151   : > { %v686_v29 = vmul.f32 %v681_v28, %v681_v28 }
 0x153   : > { %v688_v30 = vsel %vm687_vm5, %v686_v29, 0.0 }
 0x154   : > { %689 = vadd.xlane.f32.xlu0 %v688_v30 }
 0x156   : > { %v2370_v31 = vpop.f32.mrf.mxu2 }
 0x157   : > { %827 = vrot.lane.b32.xlu2 %v2370_v31, %s2116_s15  ;;  %v770_v32 = vmul.f32 %v2370_v31, %v2370_v31  ;;  %v821_v36 = vsub.f32 0.0, %v2370_v31 }
 0x158   : > { %v683_v33 = vpop.f32.mrf.mxu0 }
 0x159   : > { %v771_v34 = vsel %vm687_vm5, %v770_v32, 0.0 }
 0x15a   : > { %772 = vadd.xlane.f32.xlu1 %v771_v34 }
 0x15e   : > { %v767_v35 = vpop.f32.mrf.mxu2 }
 0x173   : > { %823 = vrot.lane.b32.xlu1 %v821_v36, %s2117_s23 }
 0x1b1   : > { %v828_v19 = vpop.permute.xlu2 %827 }
 0x1c7   : > { %v690_v46 = vpop.xlane.xlu0 %689 }
 0x1c8   : > { %v698_v47 = vmul.f32 %v697_v44, %v690_v46 }
 0x1ca   : > { %v699_v48 = vadd.f32 1e-06, %v698_v47 }
 0x1cc   : > { %1821 = vrsqrt.f32 %v699_v48  ;;  %vm706_vm8 = vweird.f32 %v699_v48 }
 0x1cd   : > { %v773_v49 = vpop.xlane.xlu1 %772 }
 0x1ce   : > { %v774_v50 = vmul.f32 %v773_v49, %v697_v44 }
 0x1d0   : > { %v775_v51 = vadd.f32 1e-06, %v774_v50 }
 0x1d2   : > { %v1822_v52 = vpop.eup %1821  ;;  %1823 = vrsqrt.f32 %v775_v51  ;;  %vm782_vm11 = vweird.f32 %v775_v51 }
 0x1d3   : > { %v701_v53 = vmul.f32 %v1822_v52, %v699_v48  ;;  %vm707_vm7 = vweird.f32 %v1822_v52 }
 0x1d4   : > { %vm708_vm9 = vmor %vm706_vm8, %vm707_vm7 }
 0x1d5   : > { %v702_v54 = vmul.f32 %v1822_v52, %v701_v53 }
 0x1d7   : > { %v703_v55 = vmul.f32 0.5, %v702_v54 }
 0x1d8   : > { %v1824_v56 = vpop.eup %1823 }
 0x1d9   : > { %v704_v57 = vsub.f32 1.5, %v703_v55  ;;  %v777_v58 = vmul.f32 %v1824_v56, %v775_v51  ;;  %vm783_vm10 = vweird.f32 %v1824_v56 }
 0x1da   : > { %vm784_vm12 = vmor %vm782_vm11, %vm783_vm10  ;;  %vm1373_vm10 = vcmask 523264  }
 0x1db   : > { %v705_v59 = vmul.f32 %v1822_v52, %v704_v57  ;;  %v778_v60 = vmul.f32 %v1824_v56, %v777_v58 }
 0x1dd   : > { %v779_v62 = vmul.f32 0.5, %v778_v60  ;;  %v709_v63 = vsel %vm708_vm9, %v1822_v52, %v705_v59 }
 0x1de   : > { %v710_v1 = vmul.f32 %v709_v63, %v681_v28 }
 0x1df   : > { %v780_v2 = vsub.f32 1.5, %v779_v62 }
 0x1e0   : > { %v714_v3 = vmul.f32 %v1812_v61, %v710_v1 }
 0x1e1   : > { %v781_v4 = vmul.f32 %v1824_v56, %v780_v2 }
 0x1e2   : > { %v717_v5 = vpack.c.bf16 %v714_v3, %v714_v3 }
 0x1e3   : > { %v785_v7 = vsel %vm784_vm12, %v1824_v56, %v781_v4 }
 0x1e4   : > { %1584 = vmatmul.msk.bf16.vlgmr.msra.gmra.mxu1 %vm687_vm5, %v717_v5  ;;  %v786_v8 = vmul.f32 %v785_v7, %v2370_v31 }
 0x1e5   : > { %v824_v18 = vpop.permute.xlu1 %823 }
 0x1e6   : > { %v790_v9 = vmul.f32 %v1813_v6, %v786_v8  ;;  %v831_v21 = vsel %vm830_vm13, %v824_v18, %v828_v19 }
 0x1e7   : > { %v832_v22 = vmul.f32 %v831_v21, %v621_v20 }
 0x1e8   : > { %v793_v10 = vpack.c.bf16 %v790_v9, %v790_v9 }
 0x1ea   : > { %1598 = vmatmul.msk.bf16.vlgmr.msra.gmra.mxu3 %vm687_vm5, %v793_v10 }
 0x261   : > { %v2382_v11 = vpop.f32.mrf.mxu1 }
 0x262   : > { %1107 = vrot.lane.b32.xlu1 %v2382_v11, %s2119_s5  ;;  %1022 = vrot.lane.b32.xlu2 %v2382_v11, %s2120_s27  ;;  %v847_v14 = vsub.f32 0.0, %v2382_v11  ;;  %s2130_s5 = smov 120   ;;  %s2131_s27 = smov 96  }
 0x263   : > { %936 = vrot.lane.b32.xlu0 %v2382_v11, %s2117_s23  ;;  %s2128_s23 = smov 56  }
 0x269   : > { %v738_v15 = vpop.f32.mrf.mxu1 }
 0x26a   : > { %849 = vrot.lane.b32.xlu1 %v847_v14, %s2116_s15  ;;  %933 = vrot.lane.b32.xlu2 %v847_v14, %s2121_s18  ;;  %s2127_s15 = smov 24   ;;  %s2135_s18 = smov 72  }
 0x26b   : > { %817 = vrot.lane.b32.xlu0 %v620_v12, %s2122_s21 }
 0x26d   : > { %v2395_v16 = vpop.f32.mrf.mxu3 }
 0x26e   : > { %v1801_v43 = vpack.i.bf16 %v2382_v11, %v2395_v16 }
 0x272   : > { %1019 = vrot.lane.b32.xlu2 %v847_v14, %s2123_s26  ;;  %s2136_s26 = smov 88  }
 0x273   : > { %853 = vrot.lane.b32.xlu0 %v2382_v11, %s2124_s25  ;;  %s1653_s25 = sshll.u32 %s2238_s22, 3 }
 0x275   : > { %v814_v17 = vpop.f32.mrf.mxu3 }
 0x27a   : > { %1104 = vrot.lane.b32.xlu2 %v847_v14, %s2125_s28  ;;  %s2587_s28 = sld [smem:[#allocation29_spill]] }
 0x27b   : > { %1015 = vrot.lane.b32.xlu0 %v620_v12, %s2126_s24 }
 0x282   : > { %834 = vrot.lane.b32.xlu2 %v832_v22, %s2122_s21 }
 0x28a   : > { %929 = vrot.lane.b32.xlu2 %v620_v12, %s2127_s15 }
 0x292   : > { %1100 = vrot.lane.b32.xlu2 %v620_v12, %s2128_s23 }
 0x2bc   : > { %v1023_v23 = vpop.permute.xlu2 %1022 }
 0x2c4   : > { %v934_v24 = vpop.permute.xlu2 %933 }
 0x2cc   : > { %v1020_v25 = vpop.permute.xlu2 %1019 }
 0x2cd   : > { %v1025_v34 = vsel %vm830_vm13, %v1020_v25, %v1023_v23 }
 0x2ce   : > { %v1026_v37 = vmul.f32 %v1025_v34, %v621_v20 }
 0x2d4   : > { %v1108_v26 = vpop.permute.xlu1 %1107  ;;  %v1105_v27 = vpop.permute.xlu2 %1104 }
 0x2d5   : > { %v937_v28 = vpop.permute.xlu0 %936  ;;  %v1110_v29 = vsel %vm830_vm13, %v1105_v27, %v1108_v26 }
 0x2d6   : > { %v939_v30 = vsel %vm830_vm13, %v934_v24, %v937_v28  ;;  %v1111_v32 = vmul.f32 %v1110_v29, %v621_v20 }
 0x2d7   : > { %v940_v33 = vmul.f32 %v939_v30, %v621_v20 }
 0x2d8   : > { %1113 = vrot.lane.b32.xlu0 %v1111_v32, %s2128_s23 }
 0x2d9   : > { %942 = vrot.lane.b32.xlu1 %v940_v33, %s2127_s15  ;;  %v838_v33 = vlaneseq }
 0x2dc   : > { %v835_v38 = vpop.permute.xlu2 %834  ;;  %v850_v40 = vpop.permute.xlu1 %849 }
 0x2dd   : > { %v818_v35 = vpop.permute.xlu0 %817 }
 0x2de   : > { %v820_v36 = vmul.f32 %v818_v35, %v2370_v31  ;;  %v839_v35 = vshrl.u32 %v838_v33, 7 }
 0x2e0   : > { %v837_v39 = vadd.f32 %v835_v38, %v820_v36  ;;  %843 = vrot.lane.b32.xlu0 %v620_v12, %s2129_s9  ;;  %v841_v36 = vand.u32 127, %v838_v33 }
 0x2e1   : > { %1028 = vrot.lane.b32.xlu1 %v1026_v37, %s2126_s24  ;;  %s1403_s24 = scalar_lea.hbm %s2587_s28, %s1653_s25 }
 0x2e2   : > { %867 = vrot.lane.b32.xlu2 %v837_v39, %s2130_s5  ;;  %vm842_vm15 = vcmp.ge.s32.totalorder %v839_v35, %v841_v36 }
 0x2e4   : > { %v930_v31 = vpop.permute.xlu2 %929 }
 0x2e5   : > { %v854_v41 = vpop.permute.xlu0 %853  ;;  %v932_v52 = vmul.f32 %v930_v31, %v2382_v11 }
 0x2e6   : > { %v856_v42 = vsel %vm830_vm13, %v850_v40, %v854_v41 }
 0x2e7   : > { %v857_v44 = vmul.f32 %v856_v42, %v621_v20 }
 0x2e8   : > { %1802 = vrot.lane.b32.xlu0 %v1801_v43, %s2131_s27 }
 0x2e9   : > { %956 = vrot.lane.b32.xlu1 %v2395_v16, %s2132_s30 }
 0x2ea   : > { %859 = vrot.lane.b32.xlu2 %v857_v44, %s2129_s9 }
 0x2ec   : > { %v1101_v45 = vpop.permute.xlu2 %1100 }
 0x2ed   : > { %v1016_v50 = vpop.permute.xlu0 %1015  ;;  %v1103_v51 = vmul.f32 %v1101_v45, %v2382_v11 }
 0x2ee   : > { %v1018_v63 = vmul.f32 %v1016_v50, %v2382_v11 }
 0x2f2   : > { %1126 = vrot.lane.b32.xlu2 %v2395_v16, %s2133_s16 }
 0x33c   : > { %v868_v46 = vpop.permute.xlu2 %867 }
 0x33d   : > { %v870_v47 = vsel %vm863_vm14, %v2395_v16, %v868_v46 }
 0x33e   : > { %v871_v48 = vpack.c.bf16 %v870_v47, %v870_v47 }
 0x340   : > { %v876_v49 = vsel %vm687_vm5, %v871_v48, 0 }
 0x341   : > { %885 = vmatpush.bf16.xpose.msrb.mxu1 %v876_v49 }
 0x344   : > { %v860_v56 = vpop.permute.xlu2 %859 }
 0x34a   : > { %v1114_v53 = vpop.permute.xlu0 %1113 }
 0x34b   : > { %v943_v54 = vpop.permute.xlu1 %942  ;;  %v1116_v55 = vadd.f32 %v1114_v53, %v1103_v51 }
 0x34c   : > { %v945_v57 = vadd.f32 %v943_v54, %v932_v52  ;;  %v1127_v2 = vpop.permute.xlu2 %1126 }
 0x34d   : > { %v1806_v58 = vpack.i.bf16 %v1116_v55, %v2382_v11  ;;  %v1129_v6 = vsel %vm863_vm14, %v1127_v2, %v868_v46 }
 0x34e   : > { %v1796_v59 = vpack.i.bf16 %v945_v57, %v2382_v11  ;;  %v1130_v10 = vpack.c.bf16 %v1129_v6, %v1129_v6 }
 0x34f   : > { %1807 = vrot.lane.b32.xlu0 %v1806_v58, %s2133_s16 }
 0x350   : > { %1797 = vrot.lane.b32.xlu1 %v1796_v59, %s2132_s30 }
 0x352   : > { %v844_v60 = vpop.permute.xlu0 %843 }
 0x353   : > { %v1029_v61 = vpop.permute.xlu1 %1028  ;;  %v846_v62 = vmul.f32 %v844_v60, %v2382_v11 }
 0x354   : > { %v1031_v3 = vadd.f32 %v1029_v61, %v1018_v63 }
 0x355   : > { %v862_v1 = vadd.f32 %v860_v56, %v846_v62  ;;  %v905_v62 = vpack.c.bf16 %v2395_v16, %v2395_v16 }
 0x357   : > { %v864_v4 = vsel %vm863_vm14, %v2382_v11, %v862_v1  ;;  %v1135_v11 = vsel %vm687_vm5, %v1130_v10, 0 }
 0x358   : > { %v865_v5 = vpack.c.bf16 %v864_v4, %v864_v4  ;;  %1036 = vrot.lane.b32.xlu1 %v1031_v3, %s2131_s27 }
 0x35a   : > { %v1803_v7 = vpop.permute.xlu0 %1802  ;;  %1599 = vmatmul.msk.bf16.vlgmr.msrb.gmra.mxu1 %vm687_vm5, %v865_v5 }
 0x35b   : > { %v957_v8 = vpop.permute.xlu1 %956  ;;  %v1804_v9 = vunpack.i.l.bf16 %v1803_v7  ;;  %v1805_v25 = vunpack.i.h.bf16 %v1803_v7 }
 0x35c   : > { %v959_v12 = vsel %vm863_vm14, %v957_v8, %v868_v46 }
 0x35d   : > { %v960_v14 = vpack.c.bf16 %v959_v12, %v959_v12  ;;  %v1044_v15 = vsel %vm863_vm14, %v1804_v9, %v868_v46 }
 0x35e   : > { %v1045_v17 = vpack.c.bf16 %v1044_v15, %v1044_v15 }
 0x35f   : > { %v965_v18 = vsel %vm687_vm5, %v960_v14, 0 }
 0x360   : > { %974 = vmatpush.bf16.xpose.msrb.mxu0 %v965_v18  ;;  %v1050_v19 = vsel %vm687_vm5, %v1045_v17, 0 }
 0x361   : > { %1059 = vmatpush.bf16.xpose.msra.mxu1 %v1050_v19 }
 0x368   : > { %1144 = vmatpush.bf16.xpose.msra.mxu0 %v1135_v11 }
 0x3c1   : > { %v1808_v28 = vpop.permute.xlu0 %1807 }
 0x3c2   : > { %v1798_v20 = vpop.permute.xlu1 %1797  ;;  %v1810_v30 = vunpack.i.h.bf16 %v1808_v28  ;;  %v1809_v32 = vunpack.i.l.bf16 %v1808_v28 }
 0x3c3   : > { %v1800_v21 = vunpack.i.h.bf16 %v1798_v20  ;;  %v1799_v22 = vunpack.i.l.bf16 %v1798_v20 }
 0x3c4   : > { %v1124_v34 = vsel %vm863_vm14, %v1809_v32, %v1810_v30 }
 0x3c5   : > { %v953_v23 = vsel %vm863_vm14, %v1799_v22, %v1800_v21  ;;  %v1125_v37 = vpack.c.bf16 %v1124_v34, %v1124_v34 }
 0x3c6   : > { %v954_v24 = vpack.c.bf16 %v953_v23, %v953_v23 }
 0x3c8   : > { %1601 = vmatmul.msk.bf16.vlgmr.msrb.gmra.mxu0 %vm687_vm5, %v954_v24 }
 0x3ca   : > { %v1037_v26 = vpop.permute.xlu1 %1036 }
 0x3cb   : > { %v1039_v27 = vsel %vm863_vm14, %v1805_v25, %v1037_v26 }
 0x3cc   : > { %v1040_v29 = vpack.c.bf16 %v1039_v27, %v1039_v27 }
 0x3ce   : > { %1603 = vmatmul.msk.bf16.vlgmr.msra.gmra.mxu1 %vm687_vm5, %v1040_v29 }
 0x3d7   : > { %v887_v38 = vpop.f32.mrf.mxu1 }
 0x3d8   : > { %v891_v39 = vmul.f32 0.25, %v887_v38  ;;  %1605 = vmatmul.msk.bf16.vlgmr.msra.gmra.mxu0 %vm687_vm5, %v1125_v37 }
 0x3da   : > { %v892_v40 = vsel %vm842_vm15, %v891_v39, -1e+30 }
 0x3db   : > { %v893_v41 = vsel %vm863_vm14, %v892_v40, -inf }
 0x3dc   : > { %894 = vmax.xlane.f32.xlu2 %v893_v41 }
 0x3df   : > { %v889_v42 = vpop.f32.mrf.mxu1 }
 0x445   : > { %v976_v43 = vpop.f32.mrf.mxu0 }
 0x446   : > { %v980_v44 = vmul.f32 0.25, %v976_v43 }
 0x448   : > { %v981_v31 = vsel %vm842_vm15, %v980_v44, -1e+30 }
 0x449   : > { %v982_v45 = vsel %vm863_vm14, %v981_v31, -inf }
 0x44a   : > { %983 = vmax.xlane.f32.xlu1 %v982_v45 }
 0x44b   : > { %v1061_v46 = vpop.f32.mrf.mxu1 }
 0x44c   : > { %v1065_v47 = vmul.f32 0.25, %v1061_v46 }
 0x44d   : > { %v978_v48 = vpop.f32.mrf.mxu0 }
 0x44e   : > { %v1066_v49 = vsel %vm842_vm15, %v1065_v47, -1e+30  ;;  %v1663_v48 = vld [vmem:[%s2553_s10 + $0x8] sm:$0xff] }
 0x44f   : > { %v895_v50 = vpop.xlane.xlu2 %894  ;;  %v1067_v51 = vsel %vm863_vm14, %v1066_v49, -inf  ;;  %1227 = vmatpush.bf16.msrb.mxu1 %v1663_v48 }
 0x450   : > { %v896_v52 = vsub.f32 %v892_v40, %v895_v50  ;;  %1068 = vmax.xlane.f32.xlu0 %v1067_v51 }
 0x452   : > { %v897_v53 = vmul.f32 1.442695, %v896_v52 }
 0x453   : > { %v1063_v54 = vpop.f32.mrf.mxu1 }
 0x454   : > { %1825 = vpow2.f32 %v897_v53 }
 0x455   : > { %v1146_v55 = vpop.f32.mrf.mxu0 }
 0x456   : > { %v1150_v56 = vmul.f32 0.25, %v1146_v55 }
 0x458   : > { %v1151_v57 = vsel %vm842_vm15, %v1150_v56, -1e+30 }
 0x459   : > { %v1152_v58 = vsel %vm863_vm14, %v1151_v57, -inf }
 0x45a   : > { %v1826_v59 = vpop.eup %1825  ;;  %1153 = vmax.xlane.f32.xlu2 %v1152_v58 }
 0x45b   : > { %v899_v60 = vsel %vm863_vm14, %v1826_v59, 0.0 }
 0x45c   : > { %900 = vadd.xlane.f32.xlu1 %v899_v60 }
 0x45d   : > { %v1148_v61 = vpop.f32.mrf.mxu0 }
 0x472   : > { %907 = vrot.lane.b32.xlu2 %v905_v62, %s2130_s5 }
 0x475   : > { %994 = vrot.lane.b32.xlu1 %v905_v62, %s2134_s17  ;;  %s2047_s17 = scalar_lea.hbm %s2587_s28, 16 }
 0x47a   : > { %1164 = vrot.lane.b32.xlu2 %v905_v62, %s2135_s18 }
 0x4bd   : > { %v984_v63 = vpop.xlane.xlu1 %983 }
 0x4be   : > { %v985_v1 = vsub.f32 %v981_v31, %v984_v63  ;;  %v1667_v63 = vld [vmem:[#allocation11 + $0x8] sm:$0xff] }
 0x4bf   : > { %1312 = vmatpush.bf16.msrb.mxu0 %v1667_v63 }
 0x4c0   : > { %v986_v2 = vmul.f32 1.442695, %v985_v1  ;;  %v1664_v1 = vld [vmem:[%s2555_s12] sm:$0xff] }
 0x4c2   : > { %1827 = vpow2.f32 %v986_v2 }
 0x4c3   : > { %v1069_v3 = vpop.xlane.xlu0 %1068 }
 0x4c4   : > { %v1070_v4 = vsub.f32 %v1066_v49, %v1069_v3  ;;  %v1662_v49 = vld [vmem:[%s2553_s10] sm:$0xff] }
 0x4c5   : > { %1228 = vmatpush.bf16.msrb.mxu1 %v1662_v49 }
 0x4c6   : > { %v1071_v5 = vmul.f32 1.442695, %v1070_v4 }
 0x4c8   : > { %v1828_v6 = vpop.eup %1827  ;;  %1829 = vpow2.f32 %v1071_v5 }
 0x4c9   : > { %v988_v7 = vsel %vm863_vm14, %v1828_v6, 0.0 }
 0x4ca   : > { %989 = vadd.xlane.f32.xlu0 %v988_v7 }
 0x4cd   : > { %v1154_v8 = vpop.xlane.xlu2 %1153 }
 0x4ce   : > { %v1830_v16 = vpop.eup %1829  ;;  %v1155_v9 = vsub.f32 %v1151_v57, %v1154_v8 }
 0x4cf   : > { %v901_v10 = vpop.xlane.xlu1 %900  ;;  %v1073_v14 = vsel %vm863_vm14, %v1830_v16, 0.0 }
 0x4d0   : > { %v1156_v12 = vmul.f32 1.442695, %v1155_v9  ;;  %1831 = vrcp.f32 %v901_v10  ;;  %v1814_v10 = vld [vmem:[#allocation10] ss:$0 sm:$0xff] }
 0x4d2   : > { %1833 = vpow2.f32 %v1156_v12  ;;  %1074 = vadd.xlane.f32.xlu0 %v1073_v14 }
 0x4d5   : > { %v908_v15 = vpop.permute.xlu2 %907 }
 0x4d6   : > { %v1832_v17 = vpop.eup %1831  ;;  %v914_v18 = vsel %vm912_vm1, %v908_v15, 0 }
 0x4d7   : > { %v903_v11 = vmul.f32 %v1832_v17, %v1826_v59  ;;  %923 = vmatpush.bf16.msrb.mxu3 %v914_v18  ;;  %v1670_v18 = vld [vmem:[%s2557_s14 + $0x10] sm:$0xff] }
 0x4d8   : > { %v1834_v19 = vpop.eup %1833 }
 0x4d9   : > { %v1158_v20 = vsel %vm863_vm14, %v1834_v19, 0.0  ;;  %v904_v21 = vpack.c.bf16 %v903_v11, %v903_v11 }
 0x4da   : > { %1159 = vadd.xlane.f32.xlu0 %v1158_v20  ;;  %v1668_v20 = vld [vmem:[%s2557_s14] sm:$0xff] }
 0x4db   : > { %1600 = vmatmul.msk.bf16.vlgmr.msrb.gmra.mxu3 %vm863_vm14, %v904_v21 }
 0x4dd   : > { %v1165_v22 = vpop.permute.xlu2 %1164 }
 0x4de   : > { %v1170_v25 = vsel %vm912_vm1, %v1165_v22, 0 }
 0x4e7   : > { %v995_v23 = vpop.permute.xlu1 %994 }
 0x4e8   : > { %v1000_v24 = vsel %vm912_vm1, %v995_v23, 0 }
 0x4e9   : > { %1009 = vmatpush.bf16.msrb.mxu2 %v1000_v24 }
 0x4ed   : > { %1179 = vmatpush.bf16.msra.mxu2 %v1170_v25 }
 0x4ee   : > { %1079 = vrot.lane.b32.xlu0 %v905_v62, %s2136_s26  ;;  %v1665_v62 = vld [vmem:[%s2555_s12 + $0x8] sm:$0xff]  ;;  %s603_s26 = sand.u32 1, %s2097_s19  }
 0x4ef   : > { %s1567_s29 = sshll.u32 %s603_s26, 3  ;;  %s1393_s5 = scalar_lea.sflag [#allocation4], %s603_s26 }
 0x53d   : > { %v990_v26 = vpop.xlane.xlu0 %989 }
 0x53e   : > { %1835 = vrcp.f32 %v990_v26 }
 0x544   : > { %v1836_v27 = vpop.eup %1835 }
 0x545   : > { %v992_v28 = vmul.f32 %v1836_v27, %v1828_v6  ;;  %v1075_v29 = vpop.xlane.xlu0 %1074 }
 0x547   : > { %v993_v30 = vpack.c.bf16 %v992_v28, %v992_v28 }
 0x549   : > { %1602 = vmatmul.msk.bf16.vlgmr.msrb.gmra.mxu2 %vm863_vm14, %v993_v30 }
 0x54d   : > { %v1160_v32 = vpop.xlane.xlu0 %1159 }
 0x54e   : > { %1837 = vrcp.f32 %v1160_v32 }
 0x54f   : > { %1839 = vrcp.f32 %v1075_v29 }
 0x554   : > { %v1838_v33 = vpop.eup %1837 }
 0x555   : > { %v1162_v34 = vmul.f32 %v1838_v33, %v1834_v19  ;;  %v1840_v36 = vpop.eup %1839  ;;  %v1669_v19 = vld [vmem:[%s2557_s14 + $0x8] sm:$0xff] }
 0x556   : > { %v1077_v38 = vmul.f32 %v1840_v36, %v1830_v16 }
 0x557   : > { %v1163_v35 = vpack.c.bf16 %v1162_v34, %v1162_v34 }
 0x558   : > { %v1078_v41 = vpack.c.bf16 %v1077_v38, %v1077_v38 }
 0x559   : > { %1606 = vmatmul.msk.bf16.vlgmr.msra.gmra.mxu2 %vm863_vm14, %v1163_v35 }
 0x55e   : > { %v925_v37 = vpop.f32.mrf.mxu3 }
 0x560   : > { %v1080_v39 = vpop.permute.xlu0 %1079 }
 0x561   : > { %v1085_v40 = vsel %vm912_vm1, %v1080_v39, 0 }
 0x562   : > { %1094 = vmatpush.bf16.msra.mxu3 %v1085_v40 }
 0x565   : > { %1604 = vmatmul.msk.bf16.vlgmr.msra.gmra.mxu3 %vm863_vm14, %v1078_v41 }
 0x566   : > { %v927_v42 = vpop.f32.mrf.mxu3  ;;  %1283 = vmatpush.bf16.msrb.mxu3 %v1665_v62 }
 0x56a   : > { %1284 = vmatpush.bf16.msrb.mxu3 %v1664_v1 }
 0x5cc   : > { %v1011_v43 = vpop.f32.mrf.mxu2 }
 0x5cd   : > { %1186 = vrot.lane.b32.xlu1 %v1011_v43, %s2129_s9  ;;  %s1407_s9 = sshll.u32 %s1403_s24, 4  ;;  %s1408_s9 = int_to_ptr.hbm [resolvable:$true] %s1407_s9 }
 0x5ce   : > { %s2041_s27 = sshra.s32 %s1408_s9, 4  ;;  %s2042_s27 = int_to_ptr.hbm [resolvable:$true] %s2041_s27 }
 0x5cf   : > { %s2043_s22 = scalar_lea.hbm %s2042_s27, 8  ;;  %p2048_p3 = scmp.lt.s32.totalorder %s2042_s27, %s2587_s28 }
 0x5d0   : > { %p2044_p0 = scmp.ne.s32.totalorder %s2042_s27, %s2043_s22  ;;  %p2049_p4 = scmp.lt.s32.totalorder %s2047_s17, %s2043_s22 }
 0x5d2   : > { %p2045_p1 = pnand %p2044_p0, %p2255_p5  ;;  %p2050_p7 = por %p2049_p4, %p2048_p3 }
 0x5d4   : > { %v1013_v44 = vpop.f32.mrf.mxu2  ;;  %p2046_p2 = pneg %p2045_p1 }
 0x5d6   : > { %p2051_p8 = pnand %p2050_p7, %p2046_p2 }
 0x5dc   : > { %v1181_v31 = vpop.f32.mrf.mxu2 }
 0x5dd   : > { %1194 = vrot.lane.b32.xlu1 %v1181_v31, %s2127_s15  ;;  %s605_s15 = scalar_lea.vmem [#allocation13], %s1567_s29 }
 0x5de   : > { %s1405_s23 = sshll.u32 %s605_s15, 4  ;;  %s1406_s23 = int_to_ptr.vmem [resolvable:$true] %s1405_s23 }
 0x5e4   : > { %v1183_v45 = vpop.f32.mrf.mxu2 }
 0x5e8   : > { %v1096_v46 = vpop.f32.mrf.mxu3 }
 0x5e9   : > { %1190 = vrot.lane.b32.xlu2 %v1096_v46, %s2122_s21 }
 0x5f0   : > { %v1098_v47 = vpop.f32.mrf.mxu3 }
 0x63f   : > { %v1187_v50 = vpop.permute.xlu1 %1186 }
 0x640   : > { %v1197_v52 = vsel %vm863_vm14, %v925_v37, %v1187_v50 }
 0x643   : > { %v1191_v51 = vpop.permute.xlu2 %1190 }
 0x644   : > { %v1198_v53 = vsel %vm687_vm5, %v1197_v52, %v1191_v51 }
 0x64f   : > { %v1195_v54 = vpop.permute.xlu1 %1194 }
 0x650   : > { %v1200_v55 = vsel %vm1199_vm2, %v1198_v53, %v1195_v54 }
 0x651   : > { %v1205_v56 = vpack.c.bf16 %v1200_v55, %v1200_v55 }
 0x653   : > { %1615 = vmatmul.msk.bf16.vlgmr.msrb.gmra.mxu1 %vm624_vm0, %v1205_v56 }
 0x6d0   : > { %v1230_v57 = vpop.f32.mrf.mxu1 }
 0x6d1   : > { %v2482_v58 = vadd.f32 %v1230_v57, %v2343_v0  ;;  %v1666_v0 = vld [vmem:[#allocation11] sm:$0xff] }
 0x6d2   : > { %1313 = vmatpush.bf16.msrb.mxu0 %v1666_v0 }
 0x6d3   : > { %v1236_v59 = vmul.f32 %v2482_v58, %v2482_v58 }
 0x6d5   : > { %v1237_v60 = vsel %vm624_vm0, %v1236_v59, 0.0 }
 0x6d6   : > { %1238 = vadd.xlane.f32.xlu2 %v1237_v60 }
 0x6d8   : > { %v1232_v61 = vpop.f32.mrf.mxu1 }
 0x749   : > { %v1239_v2 = vpop.xlane.xlu2 %1238 }
 0x74a   : > { %v1240_v3 = vmul.f32 %v1239_v2, %v2360_v13  ;;  %v1671_v13 = vld [vmem:[%s2557_s14 + $0x18] sm:$0xff] }
 0x74b   : > { %1381 = vmatpush.bf16.msrb.mxu2 %v1671_v13 }
 0x74c   : > { %v1241_v4 = vadd.f32 1e-06, %v1240_v3 }
 0x74e   : > { %1841 = vrsqrt.f32 %v1241_v4  ;;  %vm1248_vm4 = vweird.f32 %v1241_v4 }
 0x74f   : > { %1382 = vmatpush.bf16.msrb.mxu2 %v1670_v18 }
 0x753   : > { %1383 = vmatpush.bf16.msrb.mxu2 %v1669_v19 }
 0x754   : > { %v1842_v5 = vpop.eup %1841 }
 0x755   : > { %v1243_v6 = vmul.f32 %v1842_v5, %v1241_v4  ;;  %vm1249_vm3 = vweird.f32 %v1842_v5 }
 0x756   : > { %vm1250_vm5 = vmor %vm1248_vm4, %vm1249_vm3 }
 0x757   : > { %v1244_v7 = vmul.f32 %v1842_v5, %v1243_v6  ;;  %1384 = vmatpush.bf16.msrb.mxu2 %v1668_v20 }
 0x759   : > { %v1245_v8 = vmul.f32 0.5, %v1244_v7 }
 0x75b   : > { %v1246_v16 = vsub.f32 1.5, %v1245_v8 }
 0x75d   : > { %v1247_v9 = vmul.f32 %v1842_v5, %v1246_v16 }
 0x75f   : > { %v1251_v12 = vsel %vm1250_vm5, %v1842_v5, %v1247_v9 }
 0x760   : > { %v1252_v14 = vmul.f32 %v1251_v12, %v2482_v58 }
 0x762   : > { %v1256_v15 = vmul.f32 %v1814_v10, %v1252_v14 }
 0x764   : > { %v1261_v17 = vpack.c.bf16 %v1256_v15, %v1256_v15 }
 0x766   : > { %1624 = vmatmul.msk.bf16.vlgmr.msrb.gmra.mxu3 %vm624_vm0, %v1261_v17  ;;  %1633 = vmatmul.msk.bf16.vlgmr.msrb.gmra.mxu0 %vm624_vm0, %v1261_v17 }
 0x7e3   : > { %v1315_v11 = vpop.f32.mrf.mxu0 }
 0x7e9   : > { %v1286_v21 = vpop.f32.mrf.mxu3 }
 0x7ea   : > { %v1634_v22 = vmul.f32 -1.442695, %v1286_v21 }
 0x7eb   : > { %v1317_v23 = vpop.f32.mrf.mxu0 }
 0x7ec   : > { %1843 = vpow2.f32 %v1634_v22 }
 0x7f1   : > { %v1288_v24 = vpop.f32.mrf.mxu3 }
 0x7f2   : > { %v1844_v25 = vpop.eup %1843 }
 0x7f3   : > { %v1322_v26 = vadd.f32 1.0, %v1844_v25 }
 0x7f5   : > { %1845 = vrcp.f32 %v1322_v26  ;;  %v1334_v30 = vand.u32 2147483648, %v1322_v26  ;;  %v1332_v33 = vand.u32 2147483647, %v1322_v26  ;;  %vm1328_vm7 = vweird.f32 %v1322_v26 }
 0x7f7   : > { %v1335_v35 = vor.u32 1.1754944e-38, %v1334_v30  ;;  %vm1333_vm9 = vcmp.eq.f32.partialorder %v1332_v33, 8.507059e+37 }
 0x7fb   : > { %v1846_v27 = vpop.eup %1845 }
 0x7fc   : > { %v1324_v28 = vmul.f32 %v1846_v27, %v1322_v26  ;;  %vm1329_vm6 = vweird.f32 %v1846_v27 }
 0x7fd   : > { %vm1330_vm8 = vmor %vm1328_vm7, %vm1329_vm6 }
 0x7fe   : > { %v1325_v29 = vsub.f32 1.0, %v1324_v28 }
 0x800   : > { %v1326_v32 = vmul.f32 %v1846_v27, %v1325_v29 }
 0x802   : > { %v1327_v34 = vadd.f32 %v1846_v27, %v1326_v32 }
 0x804   : > { %v1331_v36 = vsel %vm1330_vm8, %v1846_v27, %v1327_v34 }
 0x805   : > { %v1336_v37 = vsel %vm1333_vm9, %v1335_v35, %v1331_v36 }
 0x806   : > { %v1338_v38 = vmul.f32 %v1336_v37, %v1286_v21 }
 0x808   : > { %v1339_v39 = vmul.f32 %v1338_v38, %v1315_v11 }
 0x80a   : > { %v1348_v40 = vpack.c.bf16 %v1339_v39, %v1339_v39 }
 0x80c   : > { %1651 = vmatmul.msk.bf16.vlgmr.msrb.gmra.mxu2 %vm1373_vm10, %v1348_v40 }
 0x88f   : > { %v1386_v41 = vpop.f32.mrf.mxu2 }
 0x890   : > { %v1390_v42 = vadd.f32 %v1386_v41, %v2482_v58 }
 0x892   : > { %1391 = vst.msk [vmem:[%s605_s15] sm:$0xff] %vm624_vm0, %v1390_v42 }
 0x893   : > { %2054 = shalt.err (!%p2051_p8)
}
 0x894   : > { %1696 = dma.vmem_to_hbm [thread:$0]  (%p2255_p5), %s1406_s23, 128, %s1408_s9, %s1393_s5  }
 0x897   : > { %v1388_v43 = vpop.f32.mrf.mxu2 }
 0x898 PF: > { %s2588_s26 = sld [smem:[#allocation21_spill]] }
 0x899   : > { %s2589_s29 = sld [smem:[#allocation19_spill]] }
 0x89e   : > { %p1733_p9 = scmp.ge.s32.totalorder %s2588_s26, 2 }
 0x89f   : > { %s1419_s21 = sand.u32 1, %s2589_s29  }
 0x8a0   : > { %p1718_p10 = pnand %p1733_p9, %p2259_p6  ;;  %s1420_s24 = scalar_lea.sflag [#allocation4], %s1419_s21 }
 0x8a2   : > { %p1719_p11 = pneg %p1718_p10 }
 0x8a4   : > { %2088 = dma.done.wait (%p1719_p11), %s1420_s24, 128  }
 0x8a5   : > { %2090 = vsyncadd (%p1719_p11), %s1420_s24, 4294967168  ;;  %s2591_s21 = sld [smem:[#allocation22_spill]]  ;;  %s2594_s18 = smov %s2097_s19 }
 0x8a6   : > { %s2592_s15 = sld [smem:[#allocation20_spill]] }
 0x8a7   : > { %s2593_s20 = sld [smem:[#allocation23_spill]] }
 0x8ab   : > { %p29_p12 = scmp.ge.s32.totalorder %s2591_s21, 4  }
 0x8ac   : > { %s2595_s19 = smov %s2592_s15 }
 0x8ad   :  { %31 = sbr.rel (!%p29_p12) target bundleno = 12 (0xc), region = 146 }
 0x8b2   :  { %1426 = vsyncpa [#allocation3], 1 }
 0x8b3   :  { %1428 = vsyncpa [#allocation3 + $0x1], 1 }
 0x8b4   :  { %1429 = vsyncpa [#allocation6], 1 }
 0x8b5   :  { %1430 = vsyncpa [#allocation9], 1 }
 0x8b6   :  { %1431 = vsyncpa [#allocation12], 1 }
 0x8b7   :  { %1432 = vsyncpa [#allocation4], 1 }
 0x8b8   :  { %1434 = vsyncpa [#allocation4 + $0x1], 1 }

</bundles_post_ra>
